<compile_context>
chip_gen: v5e
topology: v5e:2x2
jax: 0.10.0
libtpu: 0.0.40
codegen_flags: <defaults>
</compile_context>

<pallas_src>
import jax
import jax.numpy as jnp
import numpy as np
from jax.experimental import pallas as pl
from jax.experimental.pallas import tpu as pltpu
from jax.scipy.special import erf

C1, C2, K, STRIDE = 8, 256, 3, 2
P_BLOCK = 640                     # multiple of 128; 2 blocks cover the 1089 pixels


def fused_kernel(cols_ref, w1_ref, b1_ref, w2_ref, b2_ref, o_ref):
    # ConvTranspose2d (im2col matmul) + exact GELU + 1x1 conv (matmul), fully fused.
    # All intermediates are (C, P_BLOCK): lane-dense vregs, lane-dense output stores.
    v1 = jnp.dot(w1_ref[...], cols_ref[...],
                 preferred_element_type=jnp.float32) + b1_ref[...]        # (8, P_BLOCK)
    v2 = v1 * 0.5
    v3 = v1 * 0.7071067811865476
    v4 = erf(v3)
    v5 = v4 + 1.0
    v6 = v2 * v5                                                          # (8, P_BLOCK)
    o_ref[...] = jnp.dot(w2_ref[...], v6,
                         preferred_element_type=jnp.float32) + b2_ref[...]  # (256, P_BLOCK)


def model_forward(x, params):
    w1, b1, w2, b2 = params          # PyTorch layouts: w1 (1,8,3,3), b1 (8,), w2 (256,8,1,1), b2 (256,)
    n, cin, h, w = x.shape
    assert n == 1 and cin == 1
    ho = (h - 1) * STRIDE + K        # 33
    wo = (w - 1) * STRIDE + K        # 33
    p = ho * wo                      # 1089
    p_pad = ((p + P_BLOCK - 1) // P_BLOCK) * P_BLOCK   # 1280

    # Glue: turn the transposed conv into a plain correlation via zero-insertion + (K-1) padding.
    xz = jnp.zeros(((h - 1) * STRIDE + 1, (w - 1) * STRIDE + 1), x.dtype)
    xz = xz.at[::STRIDE, ::STRIDE].set(x[0, 0])
    xp = jnp.pad(xz, K - 1)                                               # (35, 35)

    # im2col with P on the last (lane) axis: (9, P_pad)
    windows = [xp[ky:ky + ho, kx:kx + wo].reshape(-1)
               for ky in range(K) for kx in range(K)]
    cols = jnp.stack(windows, axis=0)                                     # (9, P)
    cols = jnp.pad(cols, ((0, 0), (0, p_pad - p)))                        # (9, P_pad)

    w1m = jnp.flip(w1[0], axis=(-2, -1)).reshape(C1, K * K)               # (8, 9)  flipped taps
    b1r = b1.reshape(C1, 1)                                               # (8, 1)
    w2m = w2[:, :, 0, 0]                                                  # (256, 8)
    b2r = b2.reshape(C2, 1)                                               # (256, 1)

    out_flat = pl.pallas_call(
        fused_kernel,
        out_shape=jax.ShapeDtypeStruct((C2, p_pad), jnp.float32),
        grid=(p_pad // P_BLOCK,),                                         # (2,)
        in_specs=[
            pl.BlockSpec((K * K, P_BLOCK), lambda i: (0, i)),             # cols block
            pl.BlockSpec((C1, K * K), lambda i: (0, 0)),                  # resident weights
            pl.BlockSpec((C1, 1), lambda i: (0, 0)),
            pl.BlockSpec((C2, C1), lambda i: (0, 0)),
            pl.BlockSpec((C2, 1), lambda i: (0, 0)),
        ],
        out_specs=pl.BlockSpec((C2, P_BLOCK), lambda i: (0, i)),
        compiler_params=pltpu.CompilerParams(dimension_semantics=("parallel",)),
    )(cols, w1m, b1r, w2m, b2r)

    # Already in (C, P) = NCHW order: just slice off the padded tail and reshape.
    return out_flat[:, :p].reshape(C2, ho, wo)[None]


def reference_forward(x, params):
    # Pure-JAX reference (direct scatter form of ConvTranspose2d) for validation.
    w1, b1, w2, b2 = params
    xi = x[0, 0]
    v1 = jnp.zeros((C1, 33, 33), jnp.float32)
    for ky in range(K):
        for kx in range(K):
            v1 = v1.at[:, ky:ky + 31:2, kx:kx + 31:2].add(
                w1[0, :, ky, kx][:, None, None] * xi[None, :, :])
    v1 = v1 + b1[:, None, None]
    v6 = (v1 * 0.5) * (erf(v1 * 0.7071067811865476) + 1.0)
    v7 = jnp.einsum('oc,chw->ohw', w2[:, :, 0, 0], v6) + b2[:, None, None]
    return v7[None]


def init_params(key):
    k1, k2, k3, k4 = jax.random.split(key, 4)
    bound1 = 1.0 / np.sqrt(1 * K * K)
    w1 = jax.random.uniform(k1, (1, C1, K, K), jnp.float32, -bound1, bound1)
    b1 = jax.random.uniform(k2, (C1,), jnp.float32, -bound1, bound1)
    bound2 = 1.0 / np.sqrt(C1)
    w2 = jax.random.uniform(k3, (C2, C1, 1, 1), jnp.float32, -bound2, bound2)
    b2 = jax.random.uniform(k4, (C2,), jnp.float32, -bound2, bound2)
    return w1, b1, w2, b2


if __name__ == "__main__":
    key = jax.random.PRNGKey(0)
    kx, kp = jax.random.split(key)
    x1 = jax.random.normal(kx, (1, 1, 16, 16), jnp.float32)
    params = init_params(kp)

    out = jax.block_until_ready(model_forward(x1, params))
    assert out.shape == (1, C2, 33, 33), out.shape

    ref = jax.block_until_ready(reference_forward(x1, params))
    if not np.allclose(np.asarray(out), np.asarray(ref), rtol=2e-2, atol=2e-2):
        raise AssertionError("Pallas kernel output does not match reference")

    print("KERNEL_OK")
</pallas_src>

<mosaic_0001>
module attributes {stable_mosaic.version = 11 : i64} {
  func.func @fused_kernel(%arg0: i32, %arg1: memref<9x640xf32, #tpu.memory_space<vmem>>, %arg2: memref<8x9xf32, #tpu.memory_space<vmem>>, %arg3: memref<8x1xf32, #tpu.memory_space<vmem>>, %arg4: memref<256x8xf32, #tpu.memory_space<vmem>>, %arg5: memref<256x1xf32, #tpu.memory_space<vmem>>, %arg6: memref<256x640xf32, #tpu.memory_space<vmem>>) attributes {dimension_semantics = [#tpu.dimension_semantics<parallel>], iteration_bounds = array<i64: 2>, scalar_prefetch = 0 : i64, scratch_operands = 0 : i64, tpu.core_type = #tpu.core_type<tc>, window_params = [{transform_indices = @transform_0, window_bounds = array<i64: 9, 640>}, {pipeline_mode = #tpu.pipeline_mode<synchronous>, transform_indices = @transform_1, window_bounds = array<i64: 8, 9>}, {pipeline_mode = #tpu.pipeline_mode<synchronous>, transform_indices = @transform_2, window_bounds = array<i64: 8, 1>}, {pipeline_mode = #tpu.pipeline_mode<synchronous>, transform_indices = @transform_3, window_bounds = array<i64: 256, 8>}, {pipeline_mode = #tpu.pipeline_mode<synchronous>, transform_indices = @transform_4, window_bounds = array<i64: 256, 1>}, {transform_indices = @transform_5, window_bounds = array<i64: 256, 640>}]} {
    %c0 = arith.constant 0 : index
    %c0_0 = arith.constant 0 : index
    %0 = vector.load %arg2[%c0, %c0_0] : memref<8x9xf32, #tpu.memory_space<vmem>>, vector<8x9xf32>
    %c0_1 = arith.constant 0 : index
    %c0_2 = arith.constant 0 : index
    %1 = vector.load %arg1[%c0_1, %c0_2] : memref<9x640xf32, #tpu.memory_space<vmem>>, vector<9x640xf32>
    %cst = arith.constant dense<0.000000e+00> : vector<8x640xf32>
    %2 = tpu.matmul %0, %1, %cst {dimension_numbers = #tpu.dot_dimension_numbers<[1], [0], [0], [1], [0, 0, 1, 1], [], []>} : vector<8x9xf32>, vector<9x640xf32>, vector<8x640xf32> -> vector<8x640xf32>
    %c0_3 = arith.constant 0 : index
    %c0_4 = arith.constant 0 : index
    %3 = vector.load %arg3[%c0_3, %c0_4] : memref<8x1xf32, #tpu.memory_space<vmem>>, vector<8x1xf32>
    %4 = vector.broadcast %3 : vector<8x1xf32> to vector<8x640xf32>
    %5 = arith.addf %2, %4 : vector<8x640xf32>
    %cst_5 = arith.constant 5.000000e-01 : f32
    %6 = vector.broadcast %cst_5 : f32 to vector<8x640xf32>
    %7 = arith.mulf %5, %6 : vector<8x640xf32>
    %cst_6 = arith.constant 0.707106769 : f32
    %8 = vector.broadcast %cst_6 : f32 to vector<8x640xf32>
    %9 = arith.mulf %5, %8 : vector<8x640xf32>
    %10 = math.erf %9 : vector<8x640xf32>
    %cst_7 = arith.constant 1.000000e+00 : f32
    %11 = vector.broadcast %cst_7 : f32 to vector<8x640xf32>
    %12 = arith.addf %10, %11 : vector<8x640xf32>
    %13 = arith.mulf %7, %12 : vector<8x640xf32>
    %c0_8 = arith.constant 0 : index
    %c0_9 = arith.constant 0 : index
    %14 = vector.load %arg4[%c0_8, %c0_9] : memref<256x8xf32, #tpu.memory_space<vmem>>, vector<256x8xf32>
    %cst_10 = arith.constant dense<0.000000e+00> : vector<256x640xf32>
    %15 = tpu.matmul %14, %13, %cst_10 {dimension_numbers = #tpu.dot_dimension_numbers<[1], [0], [0], [1], [0, 0, 1, 1], [], []>} : vector<256x8xf32>, vector<8x640xf32>, vector<256x640xf32> -> vector<256x640xf32>
    %c0_11 = arith.constant 0 : index
    %c0_12 = arith.constant 0 : index
    %16 = vector.load %arg5[%c0_11, %c0_12] : memref<256x1xf32, #tpu.memory_space<vmem>>, vector<256x1xf32>
    %17 = vector.broadcast %16 : vector<256x1xf32> to vector<256x640xf32>
    %18 = arith.addf %15, %17 : vector<256x640xf32>
    %c0_13 = arith.constant 0 : index
    %c0_14 = arith.constant 0 : index
    %19 = vector.load %arg6[%c0_13, %c0_14] : memref<256x640xf32, #tpu.memory_space<vmem>>, vector<256x640xf32>
    tpu.vector_store %arg6[%c0_13, %c0_14], %18 {strides = array<i32>} : memref<256x640xf32, #tpu.memory_space<vmem>>, vector<256x640xf32>,
    return
  }
  func.func @transform_0(%arg0: i32) -> (i32, i32) {
    %c0_i32 = arith.constant 0 : i32
    %c0_i32_0 = arith.constant 0 : i32
    return %c0_i32, %arg0 : i32, i32
  }
  func.func @transform_1(%arg0: i32) -> (i32, i32) {
    %c0_i32 = arith.constant 0 : i32
    %c0_i32_0 = arith.constant 0 : i32
    %c0_i32_1 = arith.constant 0 : i32
    return %c0_i32, %c0_i32_0 : i32, i32
  }
  func.func @transform_2(%arg0: i32) -> (i32, i32) {
    %c0_i32 = arith.constant 0 : i32
    %c0_i32_0 = arith.constant 0 : i32
    %c0_i32_1 = arith.constant 0 : i32
    return %c0_i32, %c0_i32_0 : i32, i32
  }
  func.func @transform_3(%arg0: i32) -> (i32, i32) {
    %c0_i32 = arith.constant 0 : i32
    %c0_i32_0 = arith.constant 0 : i32
    %c0_i32_1 = arith.constant 0 : i32
    return %c0_i32, %c0_i32_0 : i32, i32
  }
  func.func @transform_4(%arg0: i32) -> (i32, i32) {
    %c0_i32 = arith.constant 0 : i32
    %c0_i32_0 = arith.constant 0 : i32
    %c0_i32_1 = arith.constant 0 : i32
    return %c0_i32, %c0_i32_0 : i32, i32
  }
  func.func @transform_5(%arg0: i32) -> (i32, i32) {
    %c0_i32 = arith.constant 0 : i32
    %c0_i32_0 = arith.constant 0 : i32
    return %c0_i32, %arg0 : i32, i32
  }
}

</mosaic_0001>

<bundles_post_ra>
// kernel: tpu_custom_call.1
= control target key start
LH: loop header
LB: loop body
LE: loop exit
PB: predicated region body
PF: predicated region fallthrough
CT: control target
= control target key end

     0   :  { %s3476_s0 = inlined_call_operand.hbm [shape: f32[9,1280], index: 0, kind: input, shape index: {}]   ;;  %s3477_s1 = inlined_call_operand.hbm [shape: f32[8,9], index: 1, kind: input, shape index: {}]   ;;  %s3478_s2 = inlined_call_operand.vmem [shape: f32[8,1], index: 2, kind: input, shape index: {}]   ;;  %s3479_s3 = inlined_call_operand.vmem [shape: f32[256,8], index: 3, kind: input, shape index: {}]   ;;  %s3480_s4 = inlined_call_operand.vmem [shape: f32[256,1], index: 4, kind: input, shape index: {}]   ;;  %s3481_s5 = inlined_call_operand.hbm [shape: f32[256,1280], index: 5, kind: output, shape index: {}]  }
   0x1   :  { %3482 = sst [smem:[#allocation12_spill]] %s3477_s1 }
   0x2   :  { %10 = vsyncpa [#allocation3], 0 }
   0x3   :  { %12 = vsyncpa [#allocation3 + $0x1], 0 }
   0x4   :  { %13 = vsyncpa [#allocation6], 0 }
   0x5   :  { %14 = vsyncpa [#allocation4], 0 }
   0x6   :  { %16 = vsyncpa [#allocation4 + $0x1], 0  ;;  %s2204_s18 = smov 0   ;;  %s2206_s19 = smov 0  }
   0x7   :  { %s2208_s20 = smov 0   ;;  %s2210_s21 = smov 0  }
   0x8 LB: > { %s2225_s22 = sadd.s32 4294967295, %s2164_s21   ;;  %s1764_s23 = sadd.s32 4294967294, %s2164_s21   ;;  %s2164_s21 = sphi %s2210_s21, %s3500_s21   ;;  %s2160_s20 = sphi %s2208_s20, %s3499_s20   ;;  %s2156_s19 = sphi %s2206_s19, %s3498_s19   ;;  %s2152_s18 = sphi %s2204_s18, %s3497_s18  }
   0x9   : > { %s2229_s24 = sadd.s32 1, %s2164_s21   ;;  %s29_s25 = sadd.s32 1, %s2160_s20 }
   0xa   : > { %s26_s26 = ssub.s32 %s2164_s21, %s2229_s24  ;;  %p36_p0 = scmp.ne.s32.totalorder %s2160_s20, %s2156_s19 }
   0xb   : > { %p27_p1 = scmp.eq.s32.totalorder %s26_s26, 0  ;;  %p37_p2 = scmp.eq.s32.totalorder %s2164_s21, 0 }
   0xc   : > { %p42_p3 = scmp.ne.s32.totalorder %s2156_s19, %s2152_s18  ;;  %p43_p4 = scmp.eq.s32.totalorder %s2225_s22, 0 }
   0xd   : > { %s2241_s27 = scalar_select %p27_p1, %s2160_s20, %s29_s25  }
   0xe   : > { %p2243_p5 = por %p37_p2, %p36_p0  ;;  %p2249_p6 = por %p43_p4, %p42_p3 }
   0xf   : > { %3483 = sst [smem:[#allocation11_spill]] %s2241_s27  ;;  %p150_p7 = scmp.eq.s32.totalorder %s2225_s22, 1 }
  0x10   : > { %p156_p8 = scmp.eq.s32.totalorder %s1764_s23, 1  ;;  %p1765_p9 = scmp.ge.s32.totalorder %s2164_s21, 1 }
  0x11   : > { %p163_p10 = scmp.lt.s32.totalorder %s2164_s21, 3  ;;  %p2256_p11 = por %p150_p7, %p36_p0 }
  0x12   : > { %p2260_p12 = por %p156_p8, %p42_p3  ;;  %s3489_s1 = sld [smem:[#allocation12_spill]] }
  0x13   : > { %p2264_p13 = pnand %p1765_p9, %p163_p10  ;;  %s2166_s11 = smov [#allocation5]  }
  0x14   : > { %s177_s12 = sshll.u32 %s2166_s11, 4  ;;  %p1978_p3 = scmp.lt.s32.totalorder %s2164_s21, 2  ;;  %s178_s12 = int_to_ptr.vmem [resolvable:$true] %s177_s12 }
  0x15   : > { %p1965_p1 = pneg %p2264_p13  ;;  %s197_s13 = sand.u32 1, %s2160_s20  }
  0x16   : > { %p2280_p7 = pnand %p1978_p3, %p2243_p5  ;;  %s1954_s15 = smul.u32 80, %s197_s13 }
  0x17   : > { %p1966_p2 = pnand %p1965_p1, %p43_p4  ;;  %s1949_s16 = smul.u32 40, %s2164_s21 }
  0x18   : > { %s175_s10 = sshll.u32 %s3489_s1, 4  ;;  %s201_s26 = scalar_lea.vmem [#allocation2], %s1954_s15  ;;  %s176_s10 = int_to_ptr.hbm [resolvable:$true] %s175_s10 }
  0x19   : > { %1968 = dma.hbm_to_vmem [thread:$0]  (!%p1966_p2), %s176_s10, 128, %s178_s12, [#allocation6]  }
  0x1a   : > { %s206_s25 = scalar_lea.hbm %s3476_s0, %s1949_s16  ;;  %s209_s8 = sshll.u32 %s201_s26, 4  ;;  %s210_s8 = int_to_ptr.vmem [resolvable:$true] %s209_s8 }
  0x1b   : > { %s207_s9 = sshll.u32 %s206_s25, 4  ;;  %s198_s11 = scalar_lea.sflag [#allocation3], %s197_s13  ;;  %s208_s9 = int_to_ptr.hbm [resolvable:$true] %s207_s9 }
  0x1c   : > { %s2064_s1 = sshra.s32 %s208_s9, 4  ;;  %p2068_p8 = pneg %p2280_p7  ;;  %s2065_s1 = int_to_ptr.hbm [resolvable:$true] %s2064_s1 }
  0x1d   : > { %s2066_s28 = scalar_lea.hbm %s2065_s1, 80  ;;  %s2071_s27 = scalar_lea.hbm %s3476_s0, 160 }
  0x1e   : > { %p2067_p5 = scmp.ne.s32.totalorder %s2065_s1, %s2066_s28  ;;  %p2072_p1 = scmp.lt.s32.totalorder %s2065_s1, %s3476_s0 }
  0x1f   : > { %p2073_p2 = scmp.lt.s32.totalorder %s2071_s27, %s2066_s28 }
  0x20   : > { %p2069_p9 = pnand %p2068_p8, %p2067_p5 }
  0x21   : > { %p2074_p3 = por %p2073_p2, %p2072_p1 }
  0x22   : > { %p2070_p10 = pneg %p2069_p9 }
  0x24   : > { %p2075_p0 = pnand %p2074_p3, %p2070_p10 }
  0x26   : > { %2078 = shalt.err (!%p2075_p0)
}
  0x27   : > { %s2167_s13 = smov 1280   ;;  %s2168_s15 = smov 640  }
  0x28   : > { %s2169_s23 = smov 40   ;;  %221 = sbr.rel (%p2264_p13) target bundleno = 697 (0x2b9), region = 40 }
  0x29   : > { %1972 = dma.hbm_to_vmem [thread:$0]  (!%p2280_p7), %s208_s9, 1280, %s210_s8, %s198_s11, %s2167_s13, %s2168_s15, %s2169_s23  }
  0x2a   : > { %s2301_s25 = sand.u32 (!%p2264_p13), 1, %s2156_s19  }
  0x2b   : > { %s1955_s1 = smul.u32 (!%p2264_p13), 80, %s2301_s25  ;;  %s224_s27 = scalar_lea.sflag (!%p2264_p13), [#allocation3], %s2301_s25 }
  0x2d   : > { %s2305_s26 = scalar_lea.vmem [#allocation2], %s1955_s1 }
  0x2e   : > { %2139 = dma.done.wait (%p2249_p6), %s224_s27, 1280  }
  0x2f   : > { %2141 = vsyncadd (%p2249_p6), %s224_s27, 4294966016 }
  0x30   : > { %2143 = dma.done.wait (%p43_p4), [#allocation6], 128  }
  0x31   : > { %2145 = vsyncadd (%p43_p4), [#allocation6], 4294967168  ;;  %v2170_v0 = vmov 0   ;;  %vm283_vm0 = vcmask 1040384   ;;  %v273_v1 = vld [vmem:[%s3478_s2] sm:$0xff]  ;;  %v266_v5 = vld [vmem:[%s2305_s26 + $0x18] sm:$0xff] }
  0x32   : > { %2021 = vset.pattern.permute.xlu0 %v2170_v0  ;;  %2022 = vset.pattern.permute.xlu1 %v2170_v0  ;;  %v268_v2 = vld [vmem:[%s2305_s26 + $0x28] sm:$0x1]  ;;  %v271_v3 = vld [vmem:[%s2305_s26 + $0x40] sm:$0x1]  ;;  %vm279_vm1 = vcmask 72704   ;;  %v265_v11 = vld [vmem:[%s2305_s26 + $0x10] sm:$0xff] }
  0x33   : > { %2023 = vset.pattern.permute.xlu2 %v2170_v0  ;;  %276 = vperm.xlu0 %2021, %v273_v1   ;;  %v263_v4 = vld [vmem:[%s2305_s26] sm:$0xff]  ;;  %v269_v7 = vld [vmem:[%s2305_s26 + $0x30] sm:$0x1]  ;;  %v264_v8 = vld [vmem:[%s2305_s26 + $0x8] sm:$0xff]  ;;  %vm843_vm10 = vcmask 64512   ;;  %s1956_s13 = smul.u32 1280, %s2301_s25 }
  0x34   : > { %1771 = vmatpush.msk.msra.mxu0 %vm283_vm0, %v268_v2  ;;  %v262_v6 = vld [vmem:[#allocation5] sm:$0xff]  ;;  %1777 = vmatpush.msk.msra.mxu3 %vm283_vm0, %v271_v3  ;;  %v270_v9 = vld [vmem:[%s2305_s26 + $0x38] sm:$0x1]  ;;  %v272_v12 = vld [vmem:[%s2305_s26 + $0x48] sm:$0x1]  ;;  %s1950_s23 = smul.u32 40, %s2225_s22 }
  0x35   : > { %v651_v10 = vld [vmem:[%s3480_s4] sm:$0xff]  ;;  %v656_v14 = vld [vmem:[%s3480_s4 + $0x28] sm:$0xff]  ;;  %v662_v16 = vld [vmem:[%s3480_s4 + $0x58] sm:$0xff]  ;;  %s2908_s15 = scalar_lea.vmem [#allocation7], %s1956_s13  ;;  %s1666_s29 = scalar_lea.sflag [#allocation4], %s2301_s25 }
  0x36   : > { %314 = vmatpush.msra.mxu0 %v263_v4  ;;  %374 = vmatpush.msra.mxu3 %v266_v5  ;;  %v267_v13 = vld [vmem:[%s2305_s26 + $0x20] sm:$0xff]  ;;  %v668_v18 = vld [vmem:[%s3480_s4 + $0x88] sm:$0xff]  ;;  %v674_v20 = vld [vmem:[%s3480_s4 + $0xb8] sm:$0xff]  ;;  %s1677_s26 = scalar_lea.hbm %s3481_s5, %s1950_s23  ;;  %s1678_s22 = sshll.u32 %s2908_s15, 4  ;;  %s1679_s22 = int_to_ptr.vmem [resolvable:$true] %s1678_s22 }
  0x37   : > { %1772 = vmatmul.msk.f32.vlgmr.msra.gmra.mxu0 %vm279_vm1, %v262_v6  ;;  %1778 = vmatmul.msk.f32.vlgmr.msra.gmra.mxu3 %vm279_vm1, %v262_v6  ;;  %v659_v15 = vld [vmem:[%s3480_s4 + $0x40] sm:$0xff]  ;;  %v665_v17 = vld [vmem:[%s3480_s4 + $0x70] sm:$0xff]  ;;  %v680_v22 = vld [vmem:[%s3480_s4 + $0xe8] sm:$0xff]  ;;  %s1680_s7 = sshll.u32 %s1677_s26, 4  ;;  %s2114_s28 = scalar_lea.hbm %s3481_s5, 2560  ;;  %s1681_s7 = int_to_ptr.hbm [resolvable:$true] %s1680_s7 }
  0x38   : > { %1773 = vmatpush.msk.msrb.mxu0 %vm283_vm0, %v269_v7  ;;  %v671_v19 = vld [vmem:[%s3480_s4 + $0xa0] sm:$0xff]  ;;  %v677_v21 = vld [vmem:[%s3480_s4 + $0xd0] sm:$0xff]  ;;  %v652_v23 = vld [vmem:[%s3480_s4 + $0x8] sm:$0xff]  ;;  %s2108_s14 = sshra.s32 %s1681_s7, 4  ;;  %s2109_s14 = int_to_ptr.hbm [resolvable:$true] %s2108_s14 }
  0x39   : > { %690 = vperm.xlu1 %2022, %v652_v23   ;;  %v653_v24 = vld [vmem:[%s3480_s4 + $0x10] sm:$0xff]  ;;  %v660_v46 = vld [vmem:[%s3480_s4 + $0x48] sm:$0xff]  ;;  %s2110_s8 = scalar_lea.hbm %s2109_s14, 1280  ;;  %p2115_p0 = scmp.lt.s32.totalorder %s2109_s14, %s3481_s5 }
  0x3a   : > { %334 = vmatpush.msrb.mxu0 %v264_v8  ;;  %v657_v30 = vld [vmem:[%s3480_s4 + $0x30] sm:$0xff]  ;;  %p2111_p4 = scmp.ne.s32.totalorder %s2109_s14, %s2110_s8  ;;  %p2116_p7 = scmp.lt.s32.totalorder %s2114_s28, %s2110_s8 }
  0x3b   : > { %685 = vperm.xlu0 %2021, %v651_v10  }
  0x3c   : > { %1775 = vmatpush.msk.msra.mxu0 %vm283_vm0, %v270_v9  ;;  %p2112_p6 = pnand %p2111_p4, %p2256_p11  ;;  %p2117_p5 = por %p2116_p7, %p2115_p0 }
  0x3e   : > { %354 = vmatpush.msra.mxu0 %v265_v11  ;;  %p2113_p13 = pneg %p2112_p6 }
  0x3f   : > { %1774 = vmatmul.msk.f32.vlgmr.msrb.gmra.mxu0 %vm279_vm1, %v262_v6 }
  0x40   : > { %1779 = vmatpush.msk.msrb.mxu0 %vm283_vm0, %v272_v12  ;;  %p2118_p8 = pnand %p2117_p5, %p2113_p13 }
  0x41   : > { %695 = vperm.xlu1 %2022, %v653_v24  }
  0x42   : > { %394 = vmatpush.msrb.mxu0 %v267_v13 }
  0x43   : > { %710 = vperm.xlu0 %2021, %v656_v14  }
  0x47   : > { %1776 = vmatmul.msk.f32.vlgmr.msra.gmra.mxu0 %vm279_vm1, %v262_v6 }
  0x49   : > { %715 = vperm.xlu1 %2022, %v657_v30  }
  0x4b   : > { %725 = vperm.xlu0 %2021, %v659_v15  }
  0x4f   : > { %1780 = vmatmul.msk.f32.vlgmr.msrb.gmra.mxu0 %vm279_vm1, %v262_v6 }
  0x51   : > { %730 = vperm.xlu1 %2022, %v660_v46  }
  0x53   : > { %740 = vperm.xlu0 %2021, %v662_v16  }
  0x5b   : > { %755 = vperm.xlu0 %2021, %v665_v17  }
  0x63   : > { %770 = vperm.xlu0 %2021, %v668_v18  }
  0x6b   : > { %785 = vperm.xlu0 %2021, %v671_v19  }
  0x73   : > { %800 = vperm.xlu0 %2021, %v674_v20  }
  0x7b   : > { %815 = vperm.xlu0 %2021, %v677_v21  }
  0x83   : > { %830 = vperm.xlu0 %2021, %v680_v22  }
  0xa5   : > { %v277_v25 = vpop.permute.xlu0 %276 }
  0xb4   : > { %v316_v26 = vpop.f32.mrf.mxu0 }
  0xb5   : > { %v2374_v27 = vadd.f32 %v316_v26, %v277_v25 }
  0xb7   : > { %v2377_v28 = vmul.f32 0.70710677, %v2374_v27 }
  0xb9   : > { %v409_v29 = vmul.f32 %v2377_v28, %v2377_v28 }
  0xba   : > { %v376_v32 = vpop.f32.mrf.mxu3 }
  0xbb   : > { %v410_v31 = vmin.f32 %v409_v29, 16.0  ;;  %v2384_v33 = vadd.f32 %v376_v32, %v277_v25 }
  0xbc   : > { %v336_v34 = vpop.f32.mrf.mxu0 }
  0xbd   : > { %v411_v35 = vmul.f32 2.1237322e-06, %v410_v31  ;;  %v422_v36 = vmul.f32 3.8918573e-05, %v410_v31  ;;  %v2386_v37 = vadd.f32 %v336_v34, %v277_v25  ;;  %v2389_v38 = vmul.f32 0.70710677, %v2384_v33 }
  0xbf   : > { %v412_v39 = vadd.f32 0.00028619796, %v411_v35  ;;  %v423_v40 = vadd.f32 0.001143296, %v422_v36  ;;  %v2392_v41 = vmul.f32 0.70710677, %v2386_v37  ;;  %v529_v42 = vmul.f32 %v2389_v38, %v2389_v38 }
  0xc1   : > { %v413_v43 = vmul.f32 %v412_v39, %v410_v31  ;;  %v424_v44 = vmul.f32 %v423_v40, %v410_v31  ;;  %v449_v45 = vmul.f32 %v2392_v41, %v2392_v41  ;;  %v2401_v47 = vmin.f32 %v529_v42, 16.0  ;;  %v654_v40 = vld [vmem:[%s3480_s4 + $0x18] sm:$0xff] }
  0xc2   : > { %700 = vperm.xlu2 %2023, %v654_v40  }
  0xc3   : > { %v414_v48 = vadd.f32 0.0036580483, %v413_v43  ;;  %v425_v49 = vadd.f32 0.014752088, %v424_v44  ;;  %v2403_v50 = vmin.f32 %v449_v45, 16.0 }
  0xc4   : > { %v531_v51 = vmul.f32 2.1237322e-06, %v2401_v47  ;;  %v542_v52 = vmul.f32 3.8918573e-05, %v2401_v47  ;;  %v356_v53 = vpop.f32.mrf.mxu0 }
  0xc5   : > { %v415_v54 = vmul.f32 %v414_v48, %v410_v31  ;;  %v426_v55 = vmul.f32 %v425_v49, %v410_v31  ;;  %v451_v56 = vmul.f32 2.1237322e-06, %v2403_v50  ;;  %v2408_v57 = vadd.f32 %v356_v53, %v277_v25 }
  0xc6   : > { %v532_v58 = vadd.f32 0.00028619796, %v531_v51  ;;  %v543_v59 = vadd.f32 0.001143296, %v542_v52  ;;  %v462_v8 = vmul.f32 3.8918573e-05, %v2403_v50 }
  0xc7   : > { %v416_v60 = vadd.f32 0.05243302, %v415_v54  ;;  %v427_v61 = vadd.f32 0.112945676, %v426_v55  ;;  %v2413_v0 = vmul.f32 0.70710677, %v2408_v57 }
  0xc8   : > { %v533_v62 = vmul.f32 %v532_v58, %v2401_v47  ;;  %v544_v63 = vmul.f32 %v543_v59, %v2401_v47  ;;  %v452_v3 = vadd.f32 0.00028619796, %v451_v56  ;;  %v463_v21 = vadd.f32 0.001143296, %v462_v8 }
  0xc9   : > { %v417_v1 = vmul.f32 %v416_v60, %v410_v31  ;;  %v428_v2 = vmul.f32 %v427_v61, %v410_v31  ;;  %v489_v6 = vmul.f32 %v2413_v0, %v2413_v0  ;;  %v2451_v56 = vmul.f32 0.5, %v2374_v27 }
  0xca   : > { %v534_v4 = vadd.f32 0.0036580483, %v533_v62  ;;  %v545_v5 = vadd.f32 0.014752088, %v544_v63  ;;  %v453_v15 = vmul.f32 %v452_v3, %v2403_v50  ;;  %v464_v36 = vmul.f32 %v463_v21, %v2403_v50 }
  0xcb   : > { %v429_v7 = vadd.f32 0.4994258, %v428_v2  ;;  %v2420_v11 = vmin.f32 %v489_v6, 16.0  ;;  %v418_v13 = vadd.f32 0.18741608, %v417_v1  ;;  %v655_v6 = vld [vmem:[%s3480_s4 + $0x20] sm:$0xff] }
  0xcc   : > { %v535_v9 = vmul.f32 %v534_v4, %v2401_v47  ;;  %v546_v10 = vmul.f32 %v545_v5, %v2401_v47  ;;  %v396_v12 = vpop.f32.mrf.mxu0  ;;  %v454_v26 = vadd.f32 0.0036580483, %v453_v15  ;;  %v465_v53 = vadd.f32 0.014752088, %v464_v36  ;;  %705 = vperm.xlu2 %2023, %v655_v6  }
  0xcd   : > { %v430_v14 = vmul.f32 %v429_v7, %v410_v31  ;;  %v491_v18 = vmul.f32 2.1237322e-06, %v2420_v11  ;;  %v2424_v20 = vadd.f32 %v396_v12, %v277_v25  ;;  %v502_v24 = vmul.f32 3.8918573e-05, %v2420_v11  ;;  %v666_v7 = vld [vmem:[%s3480_s4 + $0x78] sm:$0xff] }
  0xce   : > { %v536_v16 = vadd.f32 0.05243302, %v535_v9  ;;  %v547_v17 = vadd.f32 0.112945676, %v546_v10  ;;  %v419_v29 = vmul.f32 %v418_v13, %v410_v31  ;;  %v663_v31 = vld [vmem:[%s3480_s4 + $0x60] sm:$0xff]  ;;  %v455_v42 = vmul.f32 %v454_v26, %v2403_v50 }
  0xcf   : > { %v431_v19 = vadd.f32 1.0, %v430_v14  ;;  %v492_v23 = vadd.f32 0.00028619796, %v491_v18  ;;  %v503_v34 = vadd.f32 0.001143296, %v502_v24  ;;  %745 = vperm.xlu1 %2022, %v663_v31   ;;  %v466_v3 = vmul.f32 %v465_v53, %v2403_v50 }
  0xd0   : > { %v548_v22 = vmul.f32 %v547_v17, %v2401_v47  ;;  %v537_v30 = vmul.f32 %v536_v16, %v2401_v47  ;;  %v2430_v35 = vmul.f32 0.70710677, %v2424_v20  ;;  %v420_v45 = vadd.f32 1.1283791, %v419_v29 }
  0xd1   : > { %2024 = vrcp.f32 %v431_v19  ;;  %v493_v39 = vmul.f32 %v492_v23, %v2420_v11  ;;  %v504_v43 = vmul.f32 %v503_v34, %v2420_v11  ;;  %v441_v58 = vand.u32 2147483647, %v431_v19 }
  0xd2   : > { %v549_v32 = vadd.f32 0.4994258, %v548_v22  ;;  %v569_v44 = vmul.f32 %v2430_v35, %v2430_v35  ;;  %v538_v46 = vadd.f32 0.18741608, %v537_v30  ;;  %v456_v59 = vadd.f32 0.05243302, %v455_v42 }
  0xd3   : > { %v505_v51 = vadd.f32 0.014752088, %v504_v43  ;;  %v494_v55 = vadd.f32 0.0036580483, %v493_v39  ;;  %v443_v61 = vand.u32 2147483648, %v431_v19  ;;  %v421_v1 = vmul.f32 %v420_v45, %v2377_v28 }
  0xd4   : > { %v550_v25 = vmul.f32 %v549_v32, %v2401_v47  ;;  %v2447_v52 = vmin.f32 %v569_v44, 16.0  ;;  %vm437_vm2 = vweird.f32 %v431_v19  ;;  %v539_v2 = vmul.f32 %v538_v46, %v2401_v47 }
  0xd5   : > { %v506_v62 = vmul.f32 %v505_v51, %v2420_v11  ;;  %v495_v27 = vmul.f32 %v494_v55, %v2420_v11  ;;  %vm2465_vm4 = vcmp.eq.f32.partialorder %v441_v58, 8.507059e+37  ;;  %v457_v47 = vmul.f32 %v456_v59, %v2403_v50  ;;  %v669_v51 = vld [vmem:[%s3480_s4 + $0x90] sm:$0xff] }
  0xd6   : > { %v2445_v48 = vadd.f32 1.0, %v550_v25  ;;  %v571_v63 = vmul.f32 2.1237322e-06, %v2447_v52  ;;  %v467_v8 = vadd.f32 0.112945676, %v466_v3  ;;  %v444_v13 = vor.u32 1.1754944e-38, %v443_v61 }
  0xd7   : > { %v2025_v49 = vpop.eup %2024  ;;  %v507_v5 = vadd.f32 0.112945676, %v506_v62  ;;  %760 = vperm.xlu1 %2022, %v666_v7   ;;  %v582_v9 = vmul.f32 3.8918573e-05, %v2447_v52  ;;  %v540_v16 = vadd.f32 1.1283791, %v539_v2 }
  0xd8   : > { %v433_v54 = vmul.f32 %v2025_v49, %v431_v19  ;;  %2026 = vrcp.f32 %v2445_v48  ;;  %vm438_vm3 = vweird.f32 %v2025_v49  ;;  %v572_v15 = vadd.f32 0.00028619796, %v571_v63  ;;  %v2505_v2 = vld [vmem:[%s3479_s3] sm:$0xff]  ;;  %v2510_v3 = vld [vmem:[%s3479_s3 + $0x28] sm:$0xff] }
  0xd9   : > { %v508_v14 = vmul.f32 %v507_v5, %v2420_v11  ;;  %vm439_vm5 = vmor %vm437_vm2, %vm438_vm3  ;;  %v468_v18 = vmul.f32 %v467_v8, %v2403_v50  ;;  %v583_v21 = vadd.f32 0.001143296, %v582_v9  ;;  %v561_v23 = vand.u32 2147483647, %v2445_v48  ;;  %v661_v9 = vld [vmem:[%s3480_s4 + $0x50] sm:$0xff] }
  0xda   : > { %v434_v60 = vsub.f32 1.0, %v433_v54  ;;  %v496_v24 = vadd.f32 0.05243302, %v495_v27  ;;  %v563_v36 = vand.u32 2147483648, %v2445_v48  ;;  %v573_v39 = vmul.f32 %v572_v15, %v2447_v52 }
  0xdb   : > { %v509_v26 = vadd.f32 0.4994258, %v508_v14  ;;  %v469_v32 = vadd.f32 0.4994258, %v468_v18  ;;  %v584_v34 = vmul.f32 %v583_v21, %v2447_v52  ;;  %v458_v44 = vadd.f32 0.18741608, %v457_v47 }
  0xdc   : > { %v435_v4 = vmul.f32 %v2025_v49, %v434_v60  ;;  %v497_v45 = vmul.f32 %v496_v24, %v2420_v11  ;;  %v541_v53 = vmul.f32 %v540_v16, %v2389_v38  ;;  %vm557_vm7 = vweird.f32 %v2445_v48 }
  0xdd   : > { %v510_v25 = vmul.f32 %v509_v26, %v2420_v11  ;;  %v470_v31 = vmul.f32 %v469_v32, %v2403_v50  ;;  %v585_v42 = vadd.f32 0.014752088, %v584_v34  ;;  %v564_v59 = vor.u32 1.1754944e-38, %v563_v36  ;;  %v2550_v32 = vld [vmem:[%s3479_s3 + $0x8] sm:$0xff]  ;;  %v2555_v34 = vld [vmem:[%s3479_s3 + $0x30] sm:$0xff] }
  0xde   : > { %v2027_v10 = vpop.eup %2026  ;;  %v436_v12 = vadd.f32 %v2025_v49, %v435_v4  ;;  %vm562_vm9 = vcmp.eq.f32.partialorder %v561_v23, 8.507059e+37  ;;  %v574_v62 = vadd.f32 0.0036580483, %v573_v39  ;;  %v498_v63 = vadd.f32 0.18741608, %v497_v45  ;;  %v2520_v4 = vld [vmem:[%s3479_s3 + $0xb8] sm:$0xff] }
  0xdf   : > { %v553_v17 = vmul.f32 %v2027_v10, %v2445_v48  ;;  %vm558_vm6 = vweird.f32 %v2027_v10  ;;  %v2485_v46 = vadd.f32 1.0, %v510_v25  ;;  %v2495_v55 = vadd.f32 1.0, %v470_v31  ;;  %775 = vperm.xlu1 %2022, %v669_v51   ;;  %v2561_v25 = vld [vmem:[%s3479_s3 + $0x78] sm:$0xff]  ;;  %v2566_v39 = vld [vmem:[%s3479_s3 + $0xc0] sm:$0xff] }
  0xe0   : > { %v440_v22 = vsel %vm439_vm5, %v2025_v49, %v436_v12  ;;  %v658_v49 = vld [vmem:[%s3480_s4 + $0x38] sm:$0xff]  ;;  %vm559_vm8 = vmor %vm557_vm7, %vm558_vm6  ;;  %v586_v60 = vmul.f32 %v585_v42, %v2447_v52  ;;  %v459_v6 = vmul.f32 %v458_v44, %v2403_v50  ;;  %v575_v7 = vmul.f32 %v574_v62, %v2447_v52  ;;  %v672_v50 = vld [vmem:[%s3480_s4 + $0xa8] sm:$0xff] }
  0xe1   : > { %v445_v29 = vsel %vm2465_vm4, %v444_v13, %v440_v22  ;;  %v554_v30 = vsub.f32 1.0, %v553_v17  ;;  %720 = vperm.xlu2 %2023, %v658_v49   ;;  %2028 = vrcp.f32 %v2485_v46  ;;  %v499_v47 = vmul.f32 %v498_v63, %v2420_v11  ;;  %v675_v49 = vld [vmem:[%s3480_s4 + $0xc0] sm:$0xff]  ;;  %v2606_v63 = vld [vmem:[%s3479_s3 + $0x38] sm:$0xff] }
  0xe2   : > { %v446_v19 = vmul.f32 %v445_v29, %v421_v1  ;;  %2030 = vrcp.f32 %v2495_v55  ;;  %v587_v27 = vadd.f32 0.112945676, %v586_v60  ;;  %v402_v12 = vmul.f32 0.5, %v2384_v33 }
  0xe3   : > { %v555_v40 = vmul.f32 %v2027_v10, %v554_v30  ;;  %v460_v17 = vadd.f32 1.1283791, %v459_v6  ;;  %v576_v21 = vadd.f32 0.05243302, %v575_v7  ;;  %v500_v22 = vadd.f32 1.1283791, %v499_v47 }
  0xe4   : > { %v1781_v43 = vclamps-f32 %v446_v19, 1.0  ;;  %v588_v8 = vmul.f32 %v587_v27, %v2447_v52  ;;  %v523_v33 = vand.u32 2147483648, %v2485_v46  ;;  %v521_v29 = vand.u32 2147483647, %v2485_v46  ;;  %v2611_v27 = vld [vmem:[%s3479_s3 + $0x80] sm:$0xff] }
  0xe5   : > { %v556_v54 = vadd.f32 %v2027_v10, %v555_v40  ;;  %v483_v30 = vand.u32 2147483648, %v2495_v55  ;;  %v481_v36 = vand.u32 2147483647, %v2495_v55  ;;  %vm517_vm13 = vweird.f32 %v2485_v46 }
  0xe6   : > { %v609_v58 = vadd.f32 1.0, %v1781_v43  ;;  %v589_v15 = vadd.f32 0.4994258, %v588_v8  ;;  %v577_v42 = vmul.f32 %v576_v21, %v2447_v52  ;;  %v524_v44 = vor.u32 1.1754944e-38, %v523_v33  ;;  %v2654_v21 = vld [vmem:[%s3479_s3 + $0xd0] sm:$0xff]  ;;  %v678_v43 = vld [vmem:[%s3480_s4 + $0xd8] sm:$0xff] }
  0xe7   : > { %v560_v61 = vsel %vm559_vm8, %v2027_v10, %v556_v54  ;;  %v2029_v28 = vpop.eup %2028  ;;  %790 = vperm.xlu1 %2022, %v672_v50   ;;  %vm477_vm15 = vweird.f32 %v2495_v55  ;;  %v501_v51 = vmul.f32 %v500_v22, %v2413_v0  ;;  %vm522_vm0 = vcmp.eq.f32.partialorder %v521_v29, 8.507059e+37  ;;  %v667_v50 = vld [vmem:[%s3480_s4 + $0x80] sm:$0xff] }
  0xe8   : > { %v614_v38 = vmul.f32 %v609_v58, %v2451_v56  ;;  %v565_v48 = vsel %vm562_vm9, %v564_v59, %v560_v61  ;;  %v2515_v56 = vld [vmem:[%s3479_s3 + $0x70] sm:$0xff]  ;;  %v2031_v10 = vpop.eup %2030  ;;  %v513_v13 = vmul.f32 %v2029_v28, %v2485_v46  ;;  %v590_v24 = vmul.f32 %v589_v15, %v2447_v52  ;;  %v664_v46 = vld [vmem:[%s3480_s4 + $0x68] sm:$0xff]  ;;  %v2639_v15 = vld [vmem:[%s3479_s3 + $0x18] sm:$0xff] }
  0xe9   : > { %v566_v1 = vmul.f32 %v565_v48, %v541_v53  ;;  %v473_v14 = vmul.f32 %v2031_v10, %v2495_v55  ;;  %735 = vperm.xlu2 %2023, %v661_v9   ;;  %vm518_vm11 = vweird.f32 %v2029_v28  ;;  %vm478_vm12 = vweird.f32 %v2031_v10  ;;  %v2601_v48 = vld [vmem:[%s3479_s3 + $0x10] sm:$0xff] }
  0xea   : > { %955 = vmatpush.msra.mxu0 %v614_v38  ;;  %1951 = vmatpush.msra.mxu1 %v614_v38  ;;  %v514_v18 = vsub.f32 1.0, %v513_v13  ;;  %v2568_v40 = vadd.f32 1.0, %v590_v24  ;;  %vm2573_vm14 = vmor %vm517_vm13, %vm518_vm11  ;;  %v484_v54 = vor.u32 1.1754944e-38, %v483_v30  ;;  %v461_v55 = vmul.f32 %v460_v17, %v2392_v41  ;;  %v670_v24 = vld [vmem:[%s3480_s4 + $0x98] sm:$0xff] }
  0xeb   : > { %v1784_v5 = vclamps-f32 %v566_v1, 1.0  ;;  %1952 = vmatpush.msra.mxu2 %v614_v38  ;;  %1953 = vmatpush.msrb.mxu3 %v614_v38  ;;  %v474_v23 = vsub.f32 1.0, %v473_v14  ;;  %vm479_vm1 = vmor %vm477_vm15, %vm478_vm12  ;;  %vm482_vm2 = vcmp.eq.f32.partialorder %v481_v36, 8.507059e+37  ;;  %v578_v60 = vadd.f32 0.18741608, %v577_v42  ;;  %v2677_v36 = vld [vmem:[%s3479_s3 + $0x48] sm:$0xff] }
  0xec   : > { %1786 = vmatmul.msk.f32.vlgmr.msra.gmra.mxu0 %vm843_vm10, %v2505_v2  ;;  %1791 = vmatmul.msk.f32.vlgmr.msra.gmra.mxu1 %vm843_vm10, %v2510_v3  ;;  %v515_v26 = vmul.f32 %v2029_v28, %v514_v18  ;;  %2032 = vrcp.f32 %v2568_v40  ;;  %v401_v6 = vmul.f32 0.5, %v2408_v57  ;;  %v400_v8 = vmul.f32 0.5, %v2386_v37  ;;  %v2649_v18 = vld [vmem:[%s3479_s3 + $0x88] sm:$0xff]  ;;  %v673_v42 = vld [vmem:[%s3480_s4 + $0xb0] sm:$0xff] }
  0xed   : > { %v612_v11 = vadd.f32 1.0, %v1784_v5  ;;  %1800 = vmatmul.msk.f32.vlgmr.msra.gmra.mxu2 %vm843_vm10, %v2515_v56  ;;  %1809 = vmatmul.msk.f32.vlgmr.msrb.gmra.mxu3 %vm843_vm10, %v2520_v4  ;;  %v475_v19 = vmul.f32 %v2031_v10, %v474_v23  ;;  %v2616_v5 = vld [vmem:[%s3479_s3 + $0xc8] sm:$0xff]  ;;  %v601_v13 = vand.u32 2147483647, %v2568_v40  ;;  %vm597_vm4 = vweird.f32 %v2568_v40 }
  0xee   : > { %v516_v31 = vadd.f32 %v2029_v28, %v515_v26  ;;  %v403_v29 = vmul.f32 0.5, %v2424_v20  ;;  %v2687_v20 = vld [vmem:[%s3479_s3 + $0xd8] sm:$0xff] }
  0xef   : > { %v617_v16 = vmul.f32 %v612_v11, %v402_v12  ;;  %v476_v45 = vadd.f32 %v2031_v10, %v475_v19  ;;  %805 = vperm.xlu1 %2022, %v675_v49   ;;  %vm602_vm6 = vcmp.eq.f32.partialorder %v601_v13, 8.507059e+37  ;;  %v2672_v19 = vld [vmem:[%s3479_s3 + $0x20] sm:$0xff]  ;;  %v676_v49 = vld [vmem:[%s3480_s4 + $0xc8] sm:$0xff] }
  0xf0   : > { %v520_v53 = vsel %vm2573_vm14, %v2029_v28, %v516_v31  ;;  %v579_v28 = vmul.f32 %v578_v60, %v2447_v52  ;;  %v603_v52 = vand.u32 2147483648, %v2568_v40  ;;  %v2778_v60 = vpop.permute.xlu1 %690 }
  0xf1   : > { %1294 = vmatpush.msrb.mxu0 %v617_v16  ;;  %v525_v58 = vsel %vm522_vm0, %v524_v44, %v520_v53  ;;  %v480_v59 = vsel %vm479_vm1, %v2031_v10, %v476_v45  ;;  %750 = vperm.xlu2 %2023, %v664_v46   ;;  %v2644_v16 = vld [vmem:[%s3479_s3 + $0x40] sm:$0xff]  ;;  %v2706_v44 = vld [vmem:[%s3479_s3 + $0x50] sm:$0xff]  ;;  %v2711_v45 = vld [vmem:[%s3479_s3 + $0x98] sm:$0xff] }
  0xf2   : > { %v526_v0 = vmul.f32 %v525_v58, %v501_v51  ;;  %v485_v61 = vsel %vm482_vm2, %v484_v54, %v480_v59  ;;  %v2033_v41 = vpop.eup %2032  ;;  %v580_v12 = vadd.f32 1.1283791, %v579_v28  ;;  %v604_v17 = vor.u32 1.1754944e-38, %v603_v52  ;;  %v2716_v46 = vld [vmem:[%s3479_s3 + $0xe0] sm:$0xff]  ;;  %v2732_v51 = vld [vmem:[%s3479_s3 + $0x58] sm:$0xff]  ;;  %v2742_v54 = vld [vmem:[%s3479_s3 + $0xe8] sm:$0xff] }
  0xf3   : > { %v486_v62 = vmul.f32 %v485_v61, %v461_v55  ;;  %v593_v47 = vmul.f32 %v2033_v41, %v2568_v40  ;;  %vm598_vm3 = vweird.f32 %v2033_v41  ;;  %v2682_v40 = vld [vmem:[%s3479_s3 + $0x90] sm:$0xff]  ;;  %v2737_v53 = vld [vmem:[%s3479_s3 + $0xa0] sm:$0xff]  ;;  %v2760_v58 = vld [vmem:[%s3479_s3 + $0xa8] sm:$0xff]  ;;  %v2780_v61 = vpop.permute.xlu0 %685 }
  0xf4   : > { %1787 = vmatmul.msk.f32.gmra.mxu0 %vm843_vm10, %v2550_v32  ;;  %1792 = vmatmul.msk.f32.gmra.mxu1 %vm843_vm10, %v2555_v34  ;;  %v1783_v38 = vclamps-f32 %v526_v0, 1.0  ;;  %vm599_vm5 = vmor %vm597_vm4, %vm598_vm3  ;;  %v581_v22 = vmul.f32 %v580_v12, %v2430_v35  ;;  %v2755_v55 = vld [vmem:[%s3479_s3 + $0x60] sm:$0xff]  ;;  %v2765_v59 = vld [vmem:[%s3479_s3 + $0xf0] sm:$0xff] }
  0xf5   : > { %1801 = vmatmul.msk.f32.gmra.mxu2 %vm843_vm10, %v2561_v25  ;;  %1810 = vmatmul.msk.f32.gmra.mxu3 %vm843_vm10, %v2566_v39  ;;  %v1782_v1 = vclamps-f32 %v486_v62, 1.0  ;;  %v594_v57 = vsub.f32 1.0, %v593_v47  ;;  %v681_v0 = vld [vmem:[%s3480_s4 + $0xf0] sm:$0xff]  ;;  %v2785_v62 = vld [vmem:[%s3479_s3 + $0x68] sm:$0xff] }
  0xf6   : > { %v611_v7 = vadd.f32 1.0, %v1783_v38  ;;  %v2790_v38 = vld [vmem:[%s3479_s3 + $0xb0] sm:$0xff] }
  0xf7   : > { %v610_v9 = vadd.f32 1.0, %v1782_v1  ;;  %v595_v11 = vmul.f32 %v2033_v41, %v594_v57  ;;  %820 = vperm.xlu1 %2022, %v678_v43   ;;  %v679_v1 = vld [vmem:[%s3480_s4 + $0xe0] sm:$0xff] }
  0xf8   : > { %v616_v10 = vmul.f32 %v611_v7, %v401_v6  ;;  %v2810_v7 = vpop.permute.xlu1 %695 }
  0xf9   : > { %v615_v37 = vmul.f32 %v610_v9, %v400_v8  ;;  %765 = vperm.xlu2 %2023, %v667_v50   ;;  %v596_v14 = vadd.f32 %v2033_v41, %v595_v11 }
  0xfa   : > { %1181 = vmatpush.msra.mxu3 %v616_v10 }
  0xfb   : > { %1068 = vmatpush.msrb.mxu2 %v615_v37  ;;  %v600_v33 = vsel %vm599_vm5, %v2033_v41, %v596_v14  ;;  %v2795_v41 = vld [vmem:[%s3479_s3 + $0xf8] sm:$0xff]  ;;  %v2812_v28 = vpop.permute.xlu0 %710 }
  0xfc   : > { %1788 = vmatmul.msk.f32.gmra.mxu0 %vm843_vm10, %v2601_v48  ;;  %1793 = vmatmul.msk.f32.gmra.mxu1 %vm843_vm10, %v2606_v63  ;;  %v605_v23 = vsel %vm602_vm6, %v604_v17, %v600_v33 }
  0xfd   : > { %1802 = vmatmul.msk.f32.gmra.mxu2 %vm843_vm10, %v2611_v27  ;;  %1811 = vmatmul.msk.f32.gmra.mxu3 %vm843_vm10, %v2616_v5  ;;  %v606_v26 = vmul.f32 %v605_v23, %v581_v22 }
  0xff   : > { %v1785_v35 = vclamps-f32 %v606_v26, 1.0  ;;  %835 = vperm.xlu1 %2022, %v681_v0  }
 0x100   : > { %v2824_v8 = vpop.permute.xlu1 %715 }
 0x101   : > { %780 = vperm.xlu2 %2023, %v670_v24   ;;  %v613_v30 = vadd.f32 1.0, %v1785_v35 }
 0x103   : > { %v618_v31 = vmul.f32 %v613_v30, %v403_v29  ;;  %v2830_v9 = vpop.permute.xlu0 %725 }
 0x104   : > { %1789 = vmatmul.msk.f32.gmra.mxu0 %vm843_vm10, %v2639_v15  ;;  %1794 = vmatmul.msk.f32.gmra.mxu1 %vm843_vm10, %v2644_v16 }
 0x105   : > { %1803 = vmatmul.msk.f32.gmra.mxu2 %vm843_vm10, %v2649_v18  ;;  %1812 = vmatmul.msk.f32.gmra.mxu3 %vm843_vm10, %v2654_v21 }
 0x106   : > { %1407 = vmatpush.msrb.mxu1 %v618_v31 }
 0x108   : > { %v2847_v10 = vpop.permute.xlu1 %730 }
 0x109   : > { %795 = vperm.xlu2 %2023, %v673_v42  }
 0x10c   : > { %1790 = vmatmul.msk.f32.gmra.mxu0 %vm843_vm10, %v2672_v19  ;;  %1795 = vmatmul.msk.f32.gmra.mxu1 %vm843_vm10, %v2677_v36 }
 0x10d   : > { %1804 = vmatmul.msk.f32.gmra.mxu2 %vm843_vm10, %v2682_v40  ;;  %1813 = vmatmul.msk.f32.gmra.mxu3 %vm843_vm10, %v2687_v20 }
 0x111   : > { %810 = vperm.xlu2 %2023, %v676_v49  }
 0x114   : > { %1796 = vmatmul.msk.f32.gmra.mxu1 %vm843_vm10, %v2706_v44  ;;  %1882 = vmatmul.msk.f32.vlgmr.msrb.gmra.mxu0 %vm843_vm10, %v2505_v2 }
 0x115   : > { %1805 = vmatmul.msk.f32.gmra.mxu2 %vm843_vm10, %v2711_v45  ;;  %1814 = vmatmul.msk.f32.gmra.mxu3 %vm843_vm10, %v2716_v46 }
 0x119   : > { %825 = vperm.xlu2 %2023, %v679_v1  }
 0x11c   : > { %1797 = vmatmul.msk.f32.gmra.mxu1 %vm843_vm10, %v2732_v51  ;;  %1883 = vmatmul.msk.f32.gmra.mxu0 %vm843_vm10, %v2550_v32  ;;  %v2808_v6 = vpop.permute.xlu2 %700 }
 0x11d   : > { %1806 = vmatmul.msk.f32.gmra.mxu2 %vm843_vm10, %v2737_v53  ;;  %1815 = vmatmul.msk.f32.gmra.mxu3 %vm843_vm10, %v2742_v54 }
 0x124   : > { %1798 = vmatmul.msk.f32.gmra.mxu1 %vm843_vm10, %v2755_v55  ;;  %1884 = vmatmul.msk.f32.gmra.mxu0 %vm843_vm10, %v2601_v48 }
 0x125   : > { %1807 = vmatmul.msk.f32.gmra.mxu2 %vm843_vm10, %v2760_v58  ;;  %1816 = vmatmul.msk.f32.gmra.mxu3 %vm843_vm10, %v2765_v59 }
 0x126   : > { %v2822_v47 = vpop.permute.xlu2 %705 }
 0x12c   : > { %1799 = vmatmul.msk.f32.gmra.mxu1 %vm843_vm10, %v2785_v62  ;;  %1885 = vmatmul.msk.f32.gmra.mxu0 %vm843_vm10, %v2639_v15 }
 0x12d   : > { %1808 = vmatmul.msk.f32.gmra.mxu2 %vm843_vm10, %v2790_v38  ;;  %1817 = vmatmul.msk.f32.gmra.mxu3 %vm843_vm10, %v2795_v41 }
 0x134   : > { %1886 = vmatmul.msk.f32.gmra.mxu0 %vm843_vm10, %v2672_v19  ;;  %1914 = vmatmul.msk.f32.vlgmr.msrb.gmra.mxu1 %vm843_vm10, %v2505_v2 }
 0x135   : > { %1818 = vmatmul.msk.f32.vlgmr.msrb.gmra.mxu2 %vm843_vm10, %v2505_v2  ;;  %1850 = vmatmul.msk.f32.vlgmr.msra.gmra.mxu3 %vm843_vm10, %v2505_v2  ;;  %v682_v2 = vld [vmem:[%s3480_s4 + $0xf8] sm:$0xff] }
 0x136   : > { %840 = vperm.xlu2 %2023, %v682_v2  }
 0x13b   : > { %v2836_v50 = vpop.permute.xlu2 %720 }
 0x13c   : > { %1887 = vmatmul.msk.f32.gmra.mxu0 %vm843_vm10, %v2510_v3  ;;  %1915 = vmatmul.msk.f32.gmra.mxu1 %vm843_vm10, %v2550_v32 }
 0x13d   : > { %1819 = vmatmul.msk.f32.gmra.mxu2 %vm843_vm10, %v2550_v32  ;;  %1851 = vmatmul.msk.f32.gmra.mxu3 %vm843_vm10, %v2550_v32  ;;  %v2851_v32 = vpop.permute.xlu0 %740 }
 0x141   : > { %v2863_v37 = vpop.permute.xlu1 %745 }
 0x143   : > { %v2859_v57 = vpop.permute.xlu2 %735 }
 0x144   : > { %1888 = vmatmul.msk.f32.gmra.mxu0 %vm843_vm10, %v2555_v34  ;;  %1916 = vmatmul.msk.f32.gmra.mxu1 %vm843_vm10, %v2601_v48 }
 0x145   : > { %1820 = vmatmul.msk.f32.gmra.mxu2 %vm843_vm10, %v2601_v48  ;;  %1852 = vmatmul.msk.f32.gmra.mxu3 %vm843_vm10, %v2601_v48  ;;  %v2865_v52 = vpop.permute.xlu0 %755 }
 0x149   : > { %v2877_v12 = vpop.permute.xlu1 %760 }
 0x14b   : > { %v2875_v48 = vpop.permute.xlu2 %750 }
 0x14c   : > { %1889 = vmatmul.msk.f32.gmra.mxu0 %vm843_vm10, %v2606_v63  ;;  %1917 = vmatmul.msk.f32.gmra.mxu1 %vm843_vm10, %v2639_v15 }
 0x14d   : > { %1821 = vmatmul.msk.f32.gmra.mxu2 %vm843_vm10, %v2639_v15  ;;  %1853 = vmatmul.msk.f32.gmra.mxu3 %vm843_vm10, %v2639_v15  ;;  %v2879_v11 = vpop.permute.xlu0 %770 }
 0x151   : > { %v2891_v14 = vpop.permute.xlu1 %775 }
 0x153   : > { %v2889_v13 = vpop.permute.xlu2 %765 }
 0x154   : > { %1890 = vmatmul.msk.f32.gmra.mxu0 %vm843_vm10, %v2644_v16  ;;  %1918 = vmatmul.msk.f32.gmra.mxu1 %vm843_vm10, %v2672_v19 }
 0x155   : > { %1822 = vmatmul.msk.f32.gmra.mxu2 %vm843_vm10, %v2672_v19  ;;  %1854 = vmatmul.msk.f32.gmra.mxu3 %vm843_vm10, %v2672_v19  ;;  %v2897_v15 = vpop.permute.xlu0 %785 }
 0x15b   : > { %v2906_v23 = vpop.permute.xlu2 %780 }
 0x15c   : > { %1891 = vmatmul.msk.f32.gmra.mxu0 %vm843_vm10, %v2677_v36  ;;  %1919 = vmatmul.msk.f32.gmra.mxu1 %vm843_vm10, %v2510_v3 }
 0x15d   : > { %1823 = vmatmul.msk.f32.gmra.mxu2 %vm843_vm10, %v2510_v3  ;;  %1855 = vmatmul.msk.f32.gmra.mxu3 %vm843_vm10, %v2510_v3  ;;  %v2922_v24 = vpop.permute.xlu0 %800 }
 0x164   : > { %1892 = vmatmul.msk.f32.gmra.mxu0 %vm843_vm10, %v2706_v44  ;;  %1920 = vmatmul.msk.f32.gmra.mxu1 %vm843_vm10, %v2555_v34 }
 0x165   : > { %1824 = vmatmul.msk.f32.gmra.mxu2 %vm843_vm10, %v2555_v34  ;;  %1856 = vmatmul.msk.f32.gmra.mxu3 %vm843_vm10, %v2555_v34  ;;  %v2918_v34 = vpop.permute.xlu1 %790 }
 0x169   : > { %v957_v3 = vpop.f32.mrf.mxu0  ;;  %v972_v17 = vpop.f32.mrf.mxu1 }
 0x16a   : > { %v958_v22 = vadd.f32 %v957_v3, %v2780_v61  ;;  %v973_v33 = vadd.f32 %v972_v17, %v2812_v28 }
 0x16c   : > { %1505 = vst [vmem:[%s2908_s15] sm:$0xff] %v958_v22  ;;  %1893 = vmatmul.msk.f32.gmra.mxu0 %vm843_vm10, %v2732_v51  ;;  %1921 = vmatmul.msk.f32.gmra.mxu1 %vm843_vm10, %v2606_v63 }
 0x16d   : > { %1530 = vst [vmem:[%s2908_s15 + $0xc8] sm:$0xff] %v973_v33  ;;  %1825 = vmatmul.msk.f32.gmra.mxu2 %vm843_vm10, %v2606_v63  ;;  %1857 = vmatmul.msk.f32.gmra.mxu3 %vm843_vm10, %v2606_v63  ;;  %v2937_v63 = vpop.permute.xlu2 %795  ;;  %v2942_v49 = vpop.permute.xlu1 %805 }
 0x170   : > { %v999_v26 = vpop.f32.mrf.mxu2  ;;  %v1026_v35 = vpop.f32.mrf.mxu3 }
 0x171   : > { %v1000_v29 = vadd.f32 %v999_v26, %v2865_v52  ;;  %v1027_v30 = vadd.f32 %v1026_v35, %v2922_v24  ;;  %v960_v19 = vpop.f32.mrf.mxu0  ;;  %v975_v31 = vpop.f32.mrf.mxu1 }
 0x172   : > { %v961_v42 = vadd.f32 %v960_v19, %v2778_v60  ;;  %v976_v43 = vadd.f32 %v975_v31, %v2824_v8 }
 0x173   : > { %1575 = vst [vmem:[%s2908_s15 + $0x230] sm:$0xff] %v1000_v29 }
 0x174   : > { %1620 = vst [vmem:[%s2908_s15 + $0x398] sm:$0xff] %v1027_v30  ;;  %1894 = vmatmul.msk.f32.gmra.mxu0 %vm843_vm10, %v2755_v55  ;;  %1922 = vmatmul.msk.f32.gmra.mxu1 %vm843_vm10, %v2644_v16 }
 0x175   : > { %1510 = vst [vmem:[%s2908_s15 + $0x28] sm:$0xff] %v961_v42  ;;  %1826 = vmatmul.msk.f32.gmra.mxu2 %vm843_vm10, %v2644_v16  ;;  %1858 = vmatmul.msk.f32.gmra.mxu3 %vm843_vm10, %v2644_v16  ;;  %v2960_v16 = vpop.permute.xlu2 %810 }
 0x176   : > { %1535 = vst [vmem:[%s2908_s15 + $0xf0] sm:$0xff] %v976_v43 }
 0x178   : > { %v1002_v0 = vpop.f32.mrf.mxu2  ;;  %v1029_v1 = vpop.f32.mrf.mxu3 }
 0x179   : > { %v1003_v2 = vadd.f32 %v1002_v0, %v2877_v12  ;;  %v963_v3 = vpop.f32.mrf.mxu0  ;;  %v978_v17 = vpop.f32.mrf.mxu1  ;;  %v1030_v26 = vadd.f32 %v1029_v1, %v2942_v49 }
 0x17a   : > { %v964_v22 = vadd.f32 %v963_v3, %v2810_v7  ;;  %v979_v33 = vadd.f32 %v978_v17, %v2836_v50 }
 0x17b   : > { %1580 = vst [vmem:[%s2908_s15 + $0x258] sm:$0xff] %v1003_v2 }
 0x17c   : > { %1515 = vst [vmem:[%s2908_s15 + $0x50] sm:$0xff] %v964_v22  ;;  %1895 = vmatmul.msk.f32.gmra.mxu0 %vm843_vm10, %v2785_v62  ;;  %1923 = vmatmul.msk.f32.gmra.mxu1 %vm843_vm10, %v2677_v36 }
 0x17d   : > { %1540 = vst [vmem:[%s2908_s15 + $0x118] sm:$0xff] %v979_v33  ;;  %1827 = vmatmul.msk.f32.gmra.mxu2 %vm843_vm10, %v2677_v36  ;;  %1859 = vmatmul.msk.f32.gmra.mxu3 %vm843_vm10, %v2677_v36  ;;  %v2978_v36 = vpop.permute.xlu0 %815 }
 0x17e   : > { %1625 = vst [vmem:[%s2908_s15 + $0x3c0] sm:$0xff] %v1030_v26 }
 0x180   : > { %v1005_v35 = vpop.f32.mrf.mxu2  ;;  %v1032_v29 = vpop.f32.mrf.mxu3 }
 0x181   : > { %v1006_v30 = vadd.f32 %v1005_v35, %v2889_v13  ;;  %v966_v19 = vpop.f32.mrf.mxu0  ;;  %v981_v31 = vpop.f32.mrf.mxu1  ;;  %v1033_v0 = vadd.f32 %v1032_v29, %v2960_v16 }
 0x182   : > { %v967_v42 = vadd.f32 %v966_v19, %v2808_v6  ;;  %v982_v43 = vadd.f32 %v981_v31, %v2830_v9 }
 0x183   : > { %1585 = vst [vmem:[%s2908_s15 + $0x280] sm:$0xff] %v1006_v30 }
 0x184   : > { %1520 = vst [vmem:[%s2908_s15 + $0x78] sm:$0xff] %v967_v42  ;;  %1896 = vmatmul.msk.f32.gmra.mxu0 %vm843_vm10, %v2515_v56  ;;  %1924 = vmatmul.msk.f32.gmra.mxu1 %vm843_vm10, %v2706_v44 }
 0x185   : > { %1545 = vst [vmem:[%s2908_s15 + $0x140] sm:$0xff] %v982_v43  ;;  %1828 = vmatmul.msk.f32.gmra.mxu2 %vm843_vm10, %v2706_v44  ;;  %1860 = vmatmul.msk.f32.gmra.mxu3 %vm843_vm10, %v2706_v44  ;;  %v2996_v44 = vpop.permute.xlu1 %820 }
 0x186   : > { %1630 = vst [vmem:[%s2908_s15 + $0x3e8] sm:$0xff] %v1033_v0 }
 0x188   : > { %v1008_v1 = vpop.f32.mrf.mxu2  ;;  %v1035_v2 = vpop.f32.mrf.mxu3 }
 0x189   : > { %v1009_v3 = vadd.f32 %v1008_v1, %v2879_v11  ;;  %v1036_v17 = vadd.f32 %v1035_v2, %v2978_v36  ;;  %v969_v22 = vpop.f32.mrf.mxu0  ;;  %v984_v33 = vpop.f32.mrf.mxu1 }
 0x18a   : > { %v970_v26 = vadd.f32 %v969_v22, %v2822_v47  ;;  %v985_v35 = vadd.f32 %v984_v33, %v2847_v10 }
 0x18b   : > { %1590 = vst [vmem:[%s2908_s15 + $0x2a8] sm:$0xff] %v1009_v3 }
 0x18c   : > { %1635 = vst [vmem:[%s2908_s15 + $0x410] sm:$0xff] %v1036_v17  ;;  %1897 = vmatmul.msk.f32.gmra.mxu0 %vm843_vm10, %v2561_v25  ;;  %1925 = vmatmul.msk.f32.gmra.mxu1 %vm843_vm10, %v2732_v51 }
 0x18d   : > { %1525 = vst [vmem:[%s2908_s15 + $0xa0] sm:$0xff] %v970_v26  ;;  %1829 = vmatmul.msk.f32.gmra.mxu2 %vm843_vm10, %v2732_v51  ;;  %1861 = vmatmul.msk.f32.gmra.mxu3 %vm843_vm10, %v2732_v51  ;;  %v3014_v51 = vpop.permute.xlu2 %825 }
 0x18e   : > { %1550 = vst [vmem:[%s2908_s15 + $0x168] sm:$0xff] %v985_v35 }
 0x190   : > { %v1011_v29 = vpop.f32.mrf.mxu2  ;;  %v1038_v19 = vpop.f32.mrf.mxu3 }
 0x191   : > { %v1012_v30 = vadd.f32 %v1011_v29, %v2891_v14  ;;  %v987_v31 = vpop.f32.mrf.mxu1  ;;  %v1296_v43 = vpop.f32.mrf.mxu0  ;;  %v1039_v0 = vadd.f32 %v1038_v19, %v2996_v44 }
 0x192   : > { %v988_v42 = vadd.f32 %v987_v31, %v2859_v57  ;;  %v1297_v1 = vadd.f32 %v1296_v43, %v2780_v61 }
 0x193   : > { %1595 = vst [vmem:[%s2908_s15 + $0x2d0] sm:$0xff] %v1012_v30 }
 0x194   : > { %1555 = vst [vmem:[%s2908_s15 + $0x190] sm:$0xff] %v988_v42  ;;  %1898 = vmatmul.msk.f32.gmra.mxu0 %vm843_vm10, %v2611_v27  ;;  %1926 = vmatmul.msk.f32.gmra.mxu1 %vm843_vm10, %v2755_v55 }
 0x195   : > { %1508 = vst [vmem:[%s2908_s15 + $0x18] sm:$0xff] %v1297_v1  ;;  %1830 = vmatmul.msk.f32.gmra.mxu2 %vm843_vm10, %v2755_v55  ;;  %1862 = vmatmul.msk.f32.gmra.mxu3 %vm843_vm10, %v2755_v55  ;;  %v3032_v55 = vpop.permute.xlu0 %830 }
 0x196   : > { %1640 = vst [vmem:[%s2908_s15 + $0x438] sm:$0xff] %v1039_v0 }
 0x198   : > { %v1014_v2 = vpop.f32.mrf.mxu2  ;;  %v1041_v17 = vpop.f32.mrf.mxu3 }
 0x199   : > { %v1015_v3 = vadd.f32 %v1014_v2, %v2906_v23  ;;  %v990_v22 = vpop.f32.mrf.mxu1  ;;  %v1299_v26 = vpop.f32.mrf.mxu0  ;;  %v1042_v35 = vadd.f32 %v1041_v17, %v3014_v51 }
 0x19a   : > { %v991_v33 = vadd.f32 %v990_v22, %v2851_v32  ;;  %v1300_v29 = vadd.f32 %v1299_v26, %v2778_v60 }
 0x19b   : > { %1600 = vst [vmem:[%s2908_s15 + $0x2f8] sm:$0xff] %v1015_v3 }
 0x19c   : > { %1560 = vst [vmem:[%s2908_s15 + $0x1b8] sm:$0xff] %v991_v33  ;;  %1899 = vmatmul.msk.f32.gmra.mxu0 %vm843_vm10, %v2649_v18  ;;  %1927 = vmatmul.msk.f32.gmra.mxu1 %vm843_vm10, %v2785_v62 }
 0x19d   : > { %1513 = vst [vmem:[%s2908_s15 + $0x40] sm:$0xff] %v1300_v29  ;;  %1831 = vmatmul.msk.f32.gmra.mxu2 %vm843_vm10, %v2785_v62  ;;  %1863 = vmatmul.msk.f32.gmra.mxu3 %vm843_vm10, %v2785_v62  ;;  %v3050_v62 = vpop.permute.xlu1 %835 }
 0x19e   : > { %1645 = vst [vmem:[%s2908_s15 + $0x460] sm:$0xff] %v1042_v35 }
 0x1a0   : > { %v1017_v30 = vpop.f32.mrf.mxu2  ;;  %v1044_v31 = vpop.f32.mrf.mxu3 }
 0x1a1   : > { %v1018_v19 = vadd.f32 %v1017_v30, %v2897_v15  ;;  %v993_v42 = vpop.f32.mrf.mxu1  ;;  %v1045_v43 = vadd.f32 %v1044_v31, %v3032_v55  ;;  %v1302_v1 = vpop.f32.mrf.mxu0 }
 0x1a2   : > { %v994_v0 = vadd.f32 %v993_v42, %v2863_v37  ;;  %v1303_v2 = vadd.f32 %v1302_v1, %v2810_v7 }
 0x1a3   : > { %1605 = vst [vmem:[%s2908_s15 + $0x320] sm:$0xff] %v1018_v19 }
 0x1a4   : > { %1650 = vst [vmem:[%s2908_s15 + $0x488] sm:$0xff] %v1045_v43  ;;  %1900 = vmatmul.msk.f32.gmra.mxu0 %vm843_vm10, %v2682_v40  ;;  %1928 = vmatmul.msk.f32.gmra.mxu1 %vm843_vm10, %v2515_v56 }
 0x1a5   : > { %1565 = vst [vmem:[%s2908_s15 + $0x1e0] sm:$0xff] %v994_v0  ;;  %1832 = vmatmul.msk.f32.gmra.mxu2 %vm843_vm10, %v2515_v56  ;;  %1864 = vmatmul.msk.f32.gmra.mxu3 %vm843_vm10, %v2515_v56  ;;  %v3068_v56 = vpop.permute.xlu2 %840 }
 0x1a6   : > { %1518 = vst [vmem:[%s2908_s15 + $0x68] sm:$0xff] %v1303_v2 }
 0x1a8   : > { %v1020_v3 = vpop.f32.mrf.mxu2  ;;  %v1047_v22 = vpop.f32.mrf.mxu3 }
 0x1a9   : > { %v1021_v17 = vadd.f32 %v1020_v3, %v2918_v34  ;;  %v996_v33 = vpop.f32.mrf.mxu1  ;;  %v1305_v35 = vpop.f32.mrf.mxu0  ;;  %v1048_v29 = vadd.f32 %v1047_v22, %v3050_v62 }
 0x1aa   : > { %v997_v26 = vadd.f32 %v996_v33, %v2875_v48  ;;  %v1306_v30 = vadd.f32 %v1305_v35, %v2808_v6 }
 0x1ab   : > { %1610 = vst [vmem:[%s2908_s15 + $0x348] sm:$0xff] %v1021_v17 }
 0x1ac   : > { %1570 = vst [vmem:[%s2908_s15 + $0x208] sm:$0xff] %v997_v26  ;;  %1901 = vmatmul.msk.f32.gmra.mxu0 %vm843_vm10, %v2711_v45  ;;  %1929 = vmatmul.msk.f32.gmra.mxu1 %vm843_vm10, %v2561_v25 }
 0x1ad   : > { %1523 = vst [vmem:[%s2908_s15 + $0x90] sm:$0xff] %v1306_v30  ;;  %1833 = vmatmul.msk.f32.gmra.mxu2 %vm843_vm10, %v2561_v25  ;;  %1865 = vmatmul.msk.f32.gmra.mxu3 %vm843_vm10, %v2561_v25 }
 0x1ae   : > { %1655 = vst [vmem:[%s2908_s15 + $0x4b0] sm:$0xff] %v1048_v29 }
 0x1b0   : > { %v1023_v19 = vpop.f32.mrf.mxu2  ;;  %v1050_v42 = vpop.f32.mrf.mxu3 }
 0x1b1   : > { %v1024_v31 = vadd.f32 %v1023_v19, %v2937_v63  ;;  %v1409_v43 = vpop.f32.mrf.mxu1  ;;  %v1308_v0 = vpop.f32.mrf.mxu0  ;;  %v1051_v2 = vadd.f32 %v1050_v42, %v3068_v56 }
 0x1b2   : > { %v1410_v1 = vadd.f32 %v1409_v43, %v2780_v61  ;;  %v1309_v3 = vadd.f32 %v1308_v0, %v2822_v47 }
 0x1b3   : > { %1615 = vst [vmem:[%s2908_s15 + $0x370] sm:$0xff] %v1024_v31 }
 0x1b4   : > { %1509 = vst [vmem:[%s2908_s15 + $0x20] sm:$0xff] %v1410_v1  ;;  %1902 = vmatmul.msk.f32.gmra.mxu0 %vm843_vm10, %v2737_v53  ;;  %1930 = vmatmul.msk.f32.gmra.mxu1 %vm843_vm10, %v2611_v27 }
 0x1b5   : > { %1528 = vst [vmem:[%s2908_s15 + $0xb8] sm:$0xff] %v1309_v3  ;;  %1834 = vmatmul.msk.f32.gmra.mxu2 %vm843_vm10, %v2611_v27  ;;  %1866 = vmatmul.msk.f32.gmra.mxu3 %vm843_vm10, %v2611_v27 }
 0x1b6   : > { %1660 = vst [vmem:[%s2908_s15 + $0x4d8] sm:$0xff] %v1051_v2 }
 0x1b8   : > { %v1070_v25 = vpop.f32.mrf.mxu2  ;;  %v1183_v22 = vpop.f32.mrf.mxu3 }
 0x1b9   : > { %v1071_v17 = vadd.f32 %v1070_v25, %v2780_v61  ;;  %v1412_v33 = vpop.f32.mrf.mxu1  ;;  %v1184_v26 = vadd.f32 %v1183_v22, %v2780_v61  ;;  %v1311_v35 = vpop.f32.mrf.mxu0 }
 0x1ba   : > { %v1413_v29 = vadd.f32 %v1412_v33, %v2778_v60  ;;  %v1312_v30 = vadd.f32 %v1311_v35, %v2812_v28 }
 0x1bb   : > { %1506 = vst [vmem:[%s2908_s15 + $0x8] sm:$0xff] %v1071_v17 }
 0x1bc   : > { %1507 = vst [vmem:[%s2908_s15 + $0x10] sm:$0xff] %v1184_v26  ;;  %1903 = vmatmul.msk.f32.gmra.mxu0 %vm843_vm10, %v2760_v58  ;;  %1931 = vmatmul.msk.f32.gmra.mxu1 %vm843_vm10, %v2649_v18 }
 0x1bd   : > { %1533 = vst [vmem:[%s2908_s15 + $0xe0] sm:$0xff] %v1312_v30  ;;  %1835 = vmatmul.msk.f32.gmra.mxu2 %vm843_vm10, %v2649_v18  ;;  %1867 = vmatmul.msk.f32.gmra.mxu3 %vm843_vm10, %v2649_v18 }
 0x1be   : > { %1514 = vst [vmem:[%s2908_s15 + $0x48] sm:$0xff] %v1413_v29 }
 0x1c0   : > { %v1073_v27 = vpop.f32.mrf.mxu2  ;;  %v1186_v19 = vpop.f32.mrf.mxu3 }
 0x1c1   : > { %v1074_v61 = vadd.f32 %v1073_v27, %v2778_v60  ;;  %v1415_v31 = vpop.f32.mrf.mxu1  ;;  %v1187_v42 = vadd.f32 %v1186_v19, %v2778_v60  ;;  %v1314_v43 = vpop.f32.mrf.mxu0 }
 0x1c2   : > { %v1416_v0 = vadd.f32 %v1415_v31, %v2810_v7  ;;  %v1315_v1 = vadd.f32 %v1314_v43, %v2824_v8 }
 0x1c3   : > { %1511 = vst [vmem:[%s2908_s15 + $0x30] sm:$0xff] %v1074_v61 }
 0x1c4   : > { %1512 = vst [vmem:[%s2908_s15 + $0x38] sm:$0xff] %v1187_v42  ;;  %1904 = vmatmul.msk.f32.gmra.mxu0 %vm843_vm10, %v2790_v38  ;;  %1932 = vmatmul.msk.f32.gmra.mxu1 %vm843_vm10, %v2682_v40 }
 0x1c5   : > { %1538 = vst [vmem:[%s2908_s15 + $0x108] sm:$0xff] %v1315_v1  ;;  %1836 = vmatmul.msk.f32.gmra.mxu2 %vm843_vm10, %v2682_v40  ;;  %1868 = vmatmul.msk.f32.gmra.mxu3 %vm843_vm10, %v2682_v40 }
 0x1c6   : > { %1519 = vst [vmem:[%s2908_s15 + $0x70] sm:$0xff] %v1416_v0 }
 0x1c8   : > { %v1076_v18 = vpop.f32.mrf.mxu2  ;;  %v1189_v2 = vpop.f32.mrf.mxu3 }
 0x1c9   : > { %v1077_v60 = vadd.f32 %v1076_v18, %v2810_v7  ;;  %v1418_v3 = vpop.f32.mrf.mxu1  ;;  %v1190_v25 = vadd.f32 %v1189_v2, %v2810_v7  ;;  %v1317_v17 = vpop.f32.mrf.mxu0 }
 0x1ca   : > { %v1419_v22 = vadd.f32 %v1418_v3, %v2808_v6  ;;  %v1318_v33 = vadd.f32 %v1317_v17, %v2836_v50 }
 0x1cb   : > { %1516 = vst [vmem:[%s2908_s15 + $0x58] sm:$0xff] %v1077_v60 }
 0x1cc   : > { %1517 = vst [vmem:[%s2908_s15 + $0x60] sm:$0xff] %v1190_v25  ;;  %1905 = vmatmul.msk.f32.gmra.mxu0 %vm843_vm10, %v2520_v4  ;;  %1933 = vmatmul.msk.f32.gmra.mxu1 %vm843_vm10, %v2711_v45 }
 0x1cd   : > { %1543 = vst [vmem:[%s2908_s15 + $0x130] sm:$0xff] %v1318_v33  ;;  %1837 = vmatmul.msk.f32.gmra.mxu2 %vm843_vm10, %v2711_v45  ;;  %1869 = vmatmul.msk.f32.gmra.mxu3 %vm843_vm10, %v2711_v45 }
 0x1ce   : > { %1524 = vst [vmem:[%s2908_s15 + $0x98] sm:$0xff] %v1419_v22 }
 0x1d0   : > { %v1079_v40 = vpop.f32.mrf.mxu2  ;;  %v1192_v26 = vpop.f32.mrf.mxu3 }
 0x1d1   : > { %v1080_v7 = vadd.f32 %v1079_v40, %v2808_v6  ;;  %v1421_v35 = vpop.f32.mrf.mxu1  ;;  %v1193_v29 = vadd.f32 %v1192_v26, %v2808_v6  ;;  %v1320_v30 = vpop.f32.mrf.mxu0 }
 0x1d2   : > { %v1422_v27 = vadd.f32 %v1421_v35, %v2822_v47  ;;  %v1321_v61 = vadd.f32 %v1320_v30, %v2830_v9 }
 0x1d3   : > { %1521 = vst [vmem:[%s2908_s15 + $0x80] sm:$0xff] %v1080_v7 }
 0x1d4   : > { %1522 = vst [vmem:[%s2908_s15 + $0x88] sm:$0xff] %v1193_v29  ;;  %1906 = vmatmul.msk.f32.gmra.mxu0 %vm843_vm10, %v2566_v39  ;;  %1934 = vmatmul.msk.f32.gmra.mxu1 %vm843_vm10, %v2737_v53 }
 0x1d5   : > { %1548 = vst [vmem:[%s2908_s15 + $0x158] sm:$0xff] %v1321_v61  ;;  %1838 = vmatmul.msk.f32.gmra.mxu2 %vm843_vm10, %v2737_v53  ;;  %1870 = vmatmul.msk.f32.gmra.mxu3 %vm843_vm10, %v2737_v53 }
 0x1d6   : > { %1529 = vst [vmem:[%s2908_s15 + $0xc0] sm:$0xff] %v1422_v27 }
 0x1d8   : > { %v1082_v45 = vpop.f32.mrf.mxu2  ;;  %v1195_v19 = vpop.f32.mrf.mxu3 }
 0x1d9   : > { %v1083_v6 = vadd.f32 %v1082_v45, %v2822_v47  ;;  %v1424_v31 = vpop.f32.mrf.mxu1  ;;  %v1196_v42 = vadd.f32 %v1195_v19, %v2822_v47  ;;  %v1323_v43 = vpop.f32.mrf.mxu0 }
 0x1da   : > { %v1425_v0 = vadd.f32 %v1424_v31, %v2812_v28  ;;  %v1324_v1 = vadd.f32 %v1323_v43, %v2847_v10 }
 0x1db   : > { %1526 = vst [vmem:[%s2908_s15 + $0xa8] sm:$0xff] %v1083_v6 }
 0x1dc   : > { %1527 = vst [vmem:[%s2908_s15 + $0xb0] sm:$0xff] %v1196_v42  ;;  %1907 = vmatmul.msk.f32.gmra.mxu0 %vm843_vm10, %v2616_v5  ;;  %1935 = vmatmul.msk.f32.gmra.mxu1 %vm843_vm10, %v2760_v58 }
 0x1dd   : > { %1553 = vst [vmem:[%s2908_s15 + $0x180] sm:$0xff] %v1324_v1  ;;  %1839 = vmatmul.msk.f32.gmra.mxu2 %vm843_vm10, %v2760_v58  ;;  %1871 = vmatmul.msk.f32.gmra.mxu3 %vm843_vm10, %v2760_v58 }
 0x1de   : > { %1534 = vst [vmem:[%s2908_s15 + $0xe8] sm:$0xff] %v1425_v0 }
 0x1e0   : > { %v1085_v53 = vpop.f32.mrf.mxu2  ;;  %v1198_v18 = vpop.f32.mrf.mxu3 }
 0x1e1   : > { %v1086_v47 = vadd.f32 %v1085_v53, %v2812_v28  ;;  %v1427_v60 = vpop.f32.mrf.mxu1  ;;  %v1199_v2 = vadd.f32 %v1198_v18, %v2812_v28  ;;  %v1326_v3 = vpop.f32.mrf.mxu0 }
 0x1e2   : > { %v1428_v25 = vadd.f32 %v1427_v60, %v2824_v8  ;;  %v1327_v17 = vadd.f32 %v1326_v3, %v2859_v57 }
 0x1e3   : > { %1531 = vst [vmem:[%s2908_s15 + $0xd0] sm:$0xff] %v1086_v47 }
 0x1e4   : > { %1532 = vst [vmem:[%s2908_s15 + $0xd8] sm:$0xff] %v1199_v2  ;;  %1908 = vmatmul.msk.f32.gmra.mxu0 %vm843_vm10, %v2654_v21  ;;  %1936 = vmatmul.msk.f32.gmra.mxu1 %vm843_vm10, %v2790_v38 }
 0x1e5   : > { %1558 = vst [vmem:[%s2908_s15 + $0x1a8] sm:$0xff] %v1327_v17  ;;  %1840 = vmatmul.msk.f32.gmra.mxu2 %vm843_vm10, %v2790_v38  ;;  %1872 = vmatmul.msk.f32.gmra.mxu3 %vm843_vm10, %v2790_v38 }
 0x1e6   : > { %1539 = vst [vmem:[%s2908_s15 + $0x110] sm:$0xff] %v1428_v25 }
 0x1e8   : > { %v1088_v58 = vpop.f32.mrf.mxu2  ;;  %v1201_v22 = vpop.f32.mrf.mxu3 }
 0x1e9   : > { %v1089_v28 = vadd.f32 %v1088_v58, %v2824_v8  ;;  %v1430_v33 = vpop.f32.mrf.mxu1  ;;  %v1202_v40 = vadd.f32 %v1201_v22, %v2824_v8  ;;  %v1329_v7 = vpop.f32.mrf.mxu0 }
 0x1ea   : > { %v1431_v26 = vadd.f32 %v1430_v33, %v2836_v50  ;;  %v1330_v35 = vadd.f32 %v1329_v7, %v2851_v32 }
 0x1eb   : > { %1536 = vst [vmem:[%s2908_s15 + $0xf8] sm:$0xff] %v1089_v28 }
 0x1ec   : > { %1537 = vst [vmem:[%s2908_s15 + $0x100] sm:$0xff] %v1202_v40  ;;  %1909 = vmatmul.msk.f32.gmra.mxu0 %vm843_vm10, %v2687_v20  ;;  %1937 = vmatmul.msk.f32.gmra.mxu1 %vm843_vm10, %v2520_v4 }
 0x1ed   : > { %1563 = vst [vmem:[%s2908_s15 + $0x1d0] sm:$0xff] %v1330_v35  ;;  %1841 = vmatmul.msk.f32.gmra.mxu2 %vm843_vm10, %v2520_v4  ;;  %1873 = vmatmul.msk.f32.gmra.mxu3 %vm843_vm10, %v2520_v4 }
 0x1ee   : > { %1544 = vst [vmem:[%s2908_s15 + $0x138] sm:$0xff] %v1431_v26 }
 0x1f0   : > { %v1091_v38 = vpop.f32.mrf.mxu2  ;;  %v1204_v29 = vpop.f32.mrf.mxu3 }
 0x1f1   : > { %v1092_v8 = vadd.f32 %v1091_v38, %v2836_v50  ;;  %v1433_v30 = vpop.f32.mrf.mxu1  ;;  %v1205_v27 = vadd.f32 %v1204_v29, %v2836_v50  ;;  %v1332_v61 = vpop.f32.mrf.mxu0 }
 0x1f2   : > { %v1434_v45 = vadd.f32 %v1433_v30, %v2830_v9  ;;  %v1333_v6 = vadd.f32 %v1332_v61, %v2863_v37 }
 0x1f3   : > { %1541 = vst [vmem:[%s2908_s15 + $0x120] sm:$0xff] %v1092_v8 }
 0x1f4   : > { %1542 = vst [vmem:[%s2908_s15 + $0x128] sm:$0xff] %v1205_v27  ;;  %1910 = vmatmul.msk.f32.gmra.mxu0 %vm843_vm10, %v2716_v46  ;;  %1938 = vmatmul.msk.f32.gmra.mxu1 %vm843_vm10, %v2566_v39 }
 0x1f5   : > { %1568 = vst [vmem:[%s2908_s15 + $0x1f8] sm:$0xff] %v1333_v6  ;;  %1842 = vmatmul.msk.f32.gmra.mxu2 %vm843_vm10, %v2566_v39  ;;  %1874 = vmatmul.msk.f32.gmra.mxu3 %vm843_vm10, %v2566_v39 }
 0x1f6   : > { %1549 = vst [vmem:[%s2908_s15 + $0x160] sm:$0xff] %v1434_v45 }
 0x1f8   : > { %v1094_v4 = vpop.f32.mrf.mxu2  ;;  %v1207_v19 = vpop.f32.mrf.mxu3 }
 0x1f9   : > { %v1095_v50 = vadd.f32 %v1094_v4, %v2830_v9  ;;  %v1436_v31 = vpop.f32.mrf.mxu1  ;;  %v1208_v42 = vadd.f32 %v1207_v19, %v2830_v9  ;;  %v1335_v43 = vpop.f32.mrf.mxu0 }
 0x1fa   : > { %v1437_v0 = vadd.f32 %v1436_v31, %v2847_v10  ;;  %v1336_v1 = vadd.f32 %v1335_v43, %v2875_v48 }
 0x1fb   : > { %1546 = vst [vmem:[%s2908_s15 + $0x148] sm:$0xff] %v1095_v50 }
 0x1fc   : > { %1547 = vst [vmem:[%s2908_s15 + $0x150] sm:$0xff] %v1208_v42  ;;  %1911 = vmatmul.msk.f32.gmra.mxu0 %vm843_vm10, %v2742_v54  ;;  %1939 = vmatmul.msk.f32.gmra.mxu1 %vm843_vm10, %v2616_v5 }
 0x1fd   : > { %1573 = vst [vmem:[%s2908_s15 + $0x220] sm:$0xff] %v1336_v1  ;;  %1843 = vmatmul.msk.f32.gmra.mxu2 %vm843_vm10, %v2616_v5  ;;  %1875 = vmatmul.msk.f32.gmra.mxu3 %vm843_vm10, %v2616_v5 }
 0x1fe   : > { %1554 = vst [vmem:[%s2908_s15 + $0x188] sm:$0xff] %v1437_v0 }
 0x200   : > { %v1097_v39 = vpop.f32.mrf.mxu2  ;;  %v1210_v53 = vpop.f32.mrf.mxu3 }
 0x201   : > { %v1098_v9 = vadd.f32 %v1097_v39, %v2847_v10  ;;  %v1439_v47 = vpop.f32.mrf.mxu1  ;;  %v1211_v18 = vadd.f32 %v1210_v53, %v2847_v10  ;;  %v1338_v60 = vpop.f32.mrf.mxu0 }
 0x202   : > { %v1440_v2 = vadd.f32 %v1439_v47, %v2859_v57  ;;  %v1339_v3 = vadd.f32 %v1338_v60, %v2865_v52 }
 0x203   : > { %1551 = vst [vmem:[%s2908_s15 + $0x170] sm:$0xff] %v1098_v9 }
 0x204   : > { %1552 = vst [vmem:[%s2908_s15 + $0x178] sm:$0xff] %v1211_v18  ;;  %1912 = vmatmul.msk.f32.gmra.mxu0 %vm843_vm10, %v2765_v59  ;;  %1940 = vmatmul.msk.f32.gmra.mxu1 %vm843_vm10, %v2654_v21 }
 0x205   : > { %1578 = vst [vmem:[%s2908_s15 + $0x248] sm:$0xff] %v1339_v3  ;;  %1844 = vmatmul.msk.f32.gmra.mxu2 %vm843_vm10, %v2654_v21  ;;  %1876 = vmatmul.msk.f32.gmra.mxu3 %vm843_vm10, %v2654_v21 }
 0x206   : > { %1559 = vst [vmem:[%s2908_s15 + $0x1b0] sm:$0xff] %v1440_v2 }
 0x208   : > { %v1100_v5 = vpop.f32.mrf.mxu2  ;;  %v1213_v25 = vpop.f32.mrf.mxu3 }
 0x209   : > { %v1101_v10 = vadd.f32 %v1100_v5, %v2859_v57  ;;  %v1442_v17 = vpop.f32.mrf.mxu1  ;;  %v1214_v58 = vadd.f32 %v1213_v25, %v2859_v57  ;;  %v1341_v28 = vpop.f32.mrf.mxu0 }
 0x20a   : > { %v1443_v22 = vadd.f32 %v1442_v17, %v2851_v32  ;;  %v1342_v33 = vadd.f32 %v1341_v28, %v2877_v12 }
 0x20b   : > { %1556 = vst [vmem:[%s2908_s15 + $0x198] sm:$0xff] %v1101_v10 }
 0x20c   : > { %1557 = vst [vmem:[%s2908_s15 + $0x1a0] sm:$0xff] %v1214_v58  ;;  %1913 = vmatmul.msk.f32.gmra.mxu0 %vm843_vm10, %v2795_v41  ;;  %1941 = vmatmul.msk.f32.gmra.mxu1 %vm843_vm10, %v2687_v20 }
 0x20d   : > { %1583 = vst [vmem:[%s2908_s15 + $0x270] sm:$0xff] %v1342_v33  ;;  %1845 = vmatmul.msk.f32.gmra.mxu2 %vm843_vm10, %v2687_v20  ;;  %1877 = vmatmul.msk.f32.gmra.mxu3 %vm843_vm10, %v2687_v20 }
 0x20e   : > { %1564 = vst [vmem:[%s2908_s15 + $0x1d8] sm:$0xff] %v1443_v22 }
 0x210   : > { %v1103_v21 = vpop.f32.mrf.mxu2  ;;  %v1216_v40 = vpop.f32.mrf.mxu3 }
 0x211   : > { %v1104_v57 = vadd.f32 %v1103_v21, %v2851_v32  ;;  %v1445_v7 = vpop.f32.mrf.mxu1  ;;  %v1217_v26 = vadd.f32 %v1216_v40, %v2851_v32  ;;  %v1344_v35 = vpop.f32.mrf.mxu0 }
 0x212   : > { %v1446_v38 = vadd.f32 %v1445_v7, %v2863_v37  ;;  %v1345_v8 = vadd.f32 %v1344_v35, %v2889_v13 }
 0x213   : > { %1561 = vst [vmem:[%s2908_s15 + $0x1c0] sm:$0xff] %v1104_v57 }
 0x214   : > { %1562 = vst [vmem:[%s2908_s15 + $0x1c8] sm:$0xff] %v1217_v26  ;;  %1942 = vmatmul.msk.f32.gmra.mxu1 %vm843_vm10, %v2716_v46 }
 0x215   : > { %1588 = vst [vmem:[%s2908_s15 + $0x298] sm:$0xff] %v1345_v8  ;;  %1846 = vmatmul.msk.f32.gmra.mxu2 %vm843_vm10, %v2716_v46  ;;  %1878 = vmatmul.msk.f32.gmra.mxu3 %vm843_vm10, %v2716_v46 }
 0x216   : > { %1569 = vst [vmem:[%s2908_s15 + $0x200] sm:$0xff] %v1446_v38 }
 0x218   : > { %v1106_v20 = vpop.f32.mrf.mxu2  ;;  %v1219_v29 = vpop.f32.mrf.mxu3 }
 0x219   : > { %v1107_v32 = vadd.f32 %v1106_v20, %v2863_v37  ;;  %v1448_v30 = vpop.f32.mrf.mxu1  ;;  %v1220_v27 = vadd.f32 %v1219_v29, %v2863_v37  ;;  %v1347_v61 = vpop.f32.mrf.mxu0 }
 0x21a   : > { %v1449_v45 = vadd.f32 %v1448_v30, %v2875_v48  ;;  %v1348_v6 = vadd.f32 %v1347_v61, %v2879_v11 }
 0x21b   : > { %1566 = vst [vmem:[%s2908_s15 + $0x1e8] sm:$0xff] %v1107_v32 }
 0x21c   : > { %1567 = vst [vmem:[%s2908_s15 + $0x1f0] sm:$0xff] %v1220_v27  ;;  %1943 = vmatmul.msk.f32.gmra.mxu1 %vm843_vm10, %v2742_v54 }
 0x21d   : > { %1593 = vst [vmem:[%s2908_s15 + $0x2c0] sm:$0xff] %v1348_v6  ;;  %1847 = vmatmul.msk.f32.gmra.mxu2 %vm843_vm10, %v2742_v54  ;;  %1879 = vmatmul.msk.f32.gmra.mxu3 %vm843_vm10, %v2742_v54 }
 0x21e   : > { %1574 = vst [vmem:[%s2908_s15 + $0x228] sm:$0xff] %v1449_v45 }
 0x220   : > { %v1109_v46 = vpop.f32.mrf.mxu2  ;;  %v1222_v4 = vpop.f32.mrf.mxu3 }
 0x221   : > { %v1110_v37 = vadd.f32 %v1109_v46, %v2875_v48  ;;  %v1451_v50 = vpop.f32.mrf.mxu1  ;;  %v1223_v19 = vadd.f32 %v1222_v4, %v2875_v48  ;;  %v1350_v31 = vpop.f32.mrf.mxu0 }
 0x222   : > { %v1452_v42 = vadd.f32 %v1451_v50, %v2865_v52  ;;  %v1351_v43 = vadd.f32 %v1350_v31, %v2891_v14 }
 0x223   : > { %1571 = vst [vmem:[%s2908_s15 + $0x210] sm:$0xff] %v1110_v37 }
 0x224   : > { %1572 = vst [vmem:[%s2908_s15 + $0x218] sm:$0xff] %v1223_v19  ;;  %1944 = vmatmul.msk.f32.gmra.mxu1 %vm843_vm10, %v2765_v59 }
 0x225   : > { %1598 = vst [vmem:[%s2908_s15 + $0x2e8] sm:$0xff] %v1351_v43  ;;  %1848 = vmatmul.msk.f32.gmra.mxu2 %vm843_vm10, %v2765_v59  ;;  %1880 = vmatmul.msk.f32.gmra.mxu3 %vm843_vm10, %v2765_v59 }
 0x226   : > { %1579 = vst [vmem:[%s2908_s15 + $0x250] sm:$0xff] %v1452_v42 }
 0x228   : > { %v1112_v54 = vpop.f32.mrf.mxu2  ;;  %v1225_v0 = vpop.f32.mrf.mxu3 }
 0x229   : > { %v1113_v48 = vadd.f32 %v1112_v54, %v2865_v52  ;;  %v1454_v1 = vpop.f32.mrf.mxu1  ;;  %v1226_v39 = vadd.f32 %v1225_v0, %v2865_v52  ;;  %v1353_v9 = vpop.f32.mrf.mxu0 }
 0x22a   : > { %v1455_v53 = vadd.f32 %v1454_v1, %v2877_v12  ;;  %v1354_v47 = vadd.f32 %v1353_v9, %v2906_v23 }
 0x22b   : > { %1576 = vst [vmem:[%s2908_s15 + $0x238] sm:$0xff] %v1113_v48 }
 0x22c   : > { %1577 = vst [vmem:[%s2908_s15 + $0x240] sm:$0xff] %v1226_v39  ;;  %1945 = vmatmul.msk.f32.gmra.mxu1 %vm843_vm10, %v2795_v41 }
 0x22d   : > { %1603 = vst [vmem:[%s2908_s15 + $0x310] sm:$0xff] %v1354_v47  ;;  %1849 = vmatmul.msk.f32.gmra.mxu2 %vm843_vm10, %v2795_v41  ;;  %1881 = vmatmul.msk.f32.gmra.mxu3 %vm843_vm10, %v2795_v41 }
 0x22e   : > { %1584 = vst [vmem:[%s2908_s15 + $0x278] sm:$0xff] %v1455_v53 }
 0x230   : > { %v1115_v59 = vpop.f32.mrf.mxu2  ;;  %v1228_v18 = vpop.f32.mrf.mxu3 }
 0x231   : > { %v1116_v52 = vadd.f32 %v1115_v59, %v2877_v12  ;;  %v1457_v60 = vpop.f32.mrf.mxu1  ;;  %v1229_v2 = vadd.f32 %v1228_v18, %v2877_v12  ;;  %v1356_v3 = vpop.f32.mrf.mxu0 }
 0x232   : > { %v1458_v5 = vadd.f32 %v1457_v60, %v2889_v13  ;;  %v1357_v10 = vadd.f32 %v1356_v3, %v2897_v15 }
 0x233   : > { %1581 = vst [vmem:[%s2908_s15 + $0x260] sm:$0xff] %v1116_v52 }
 0x234   : > { %1582 = vst [vmem:[%s2908_s15 + $0x268] sm:$0xff] %v1229_v2 }
 0x235   : > { %1608 = vst [vmem:[%s2908_s15 + $0x338] sm:$0xff] %v1357_v10 }
 0x236   : > { %1589 = vst [vmem:[%s2908_s15 + $0x2a0] sm:$0xff] %v1458_v5 }
 0x238   : > { %v1118_v41 = vpop.f32.mrf.mxu2  ;;  %v1231_v17 = vpop.f32.mrf.mxu3 }
 0x239   : > { %v1119_v25 = vadd.f32 %v1118_v41, %v2889_v13  ;;  %v1460_v58 = vpop.f32.mrf.mxu1  ;;  %v1232_v12 = vadd.f32 %v1231_v17, %v2889_v13  ;;  %v1359_v28 = vpop.f32.mrf.mxu0 }
 0x23a   : > { %v1461_v22 = vadd.f32 %v1460_v58, %v2879_v11  ;;  %v1360_v33 = vadd.f32 %v1359_v28, %v2918_v34 }
 0x23b   : > { %1586 = vst [vmem:[%s2908_s15 + $0x288] sm:$0xff] %v1119_v25 }
 0x23c   : > { %1587 = vst [vmem:[%s2908_s15 + $0x290] sm:$0xff] %v1232_v12 }
 0x23d   : > { %1613 = vst [vmem:[%s2908_s15 + $0x360] sm:$0xff] %v1360_v33 }
 0x23e   : > { %1594 = vst [vmem:[%s2908_s15 + $0x2c8] sm:$0xff] %v1461_v22 }
 0x240   : > { %v1121_v21 = vpop.f32.mrf.mxu2  ;;  %v1234_v40 = vpop.f32.mrf.mxu3 }
 0x241   : > { %v1122_v57 = vadd.f32 %v1121_v21, %v2879_v11  ;;  %v1463_v7 = vpop.f32.mrf.mxu1  ;;  %v1235_v13 = vadd.f32 %v1234_v40, %v2879_v11  ;;  %v1362_v26 = vpop.f32.mrf.mxu0 }
 0x242   : > { %v1464_v35 = vadd.f32 %v1463_v7, %v2891_v14  ;;  %v1363_v38 = vadd.f32 %v1362_v26, %v2937_v63 }
 0x243   : > { %1591 = vst [vmem:[%s2908_s15 + $0x2b0] sm:$0xff] %v1122_v57 }
 0x244   : > { %1592 = vst [vmem:[%s2908_s15 + $0x2b8] sm:$0xff] %v1235_v13 }
 0x245   : > { %1618 = vst [vmem:[%s2908_s15 + $0x388] sm:$0xff] %v1363_v38 }
 0x246   : > { %1599 = vst [vmem:[%s2908_s15 + $0x2f0] sm:$0xff] %v1464_v35 }
 0x248   : > { %v1124_v8 = vpop.f32.mrf.mxu2  ;;  %v1237_v32 = vpop.f32.mrf.mxu3 }
 0x249   : > { %v1125_v20 = vadd.f32 %v1124_v8, %v2891_v14  ;;  %v1466_v29 = vpop.f32.mrf.mxu1  ;;  %v1238_v11 = vadd.f32 %v1237_v32, %v2891_v14  ;;  %v1365_v30 = vpop.f32.mrf.mxu0 }
 0x24a   : > { %v1467_v27 = vadd.f32 %v1466_v29, %v2906_v23  ;;  %v1366_v61 = vadd.f32 %v1365_v30, %v2922_v24 }
 0x24b   : > { %1596 = vst [vmem:[%s2908_s15 + $0x2d8] sm:$0xff] %v1125_v20 }
 0x24c   : > { %1597 = vst [vmem:[%s2908_s15 + $0x2e0] sm:$0xff] %v1238_v11 }
 0x24d   : > { %1623 = vst [vmem:[%s2908_s15 + $0x3b0] sm:$0xff] %v1366_v61 }
 0x24e   : > { %1604 = vst [vmem:[%s2908_s15 + $0x318] sm:$0xff] %v1467_v27 }
 0x250   : > { %v1127_v45 = vpop.f32.mrf.mxu2  ;;  %v1240_v46 = vpop.f32.mrf.mxu3 }
 0x251   : > { %v1128_v6 = vadd.f32 %v1127_v45, %v2906_v23  ;;  %v1469_v37 = vpop.f32.mrf.mxu1  ;;  %v1241_v14 = vadd.f32 %v1240_v46, %v2906_v23  ;;  %v1368_v4 = vpop.f32.mrf.mxu0 }
 0x252   : > { %v1470_v50 = vadd.f32 %v1469_v37, %v2897_v15  ;;  %v1369_v19 = vadd.f32 %v1368_v4, %v2942_v49 }
 0x253   : > { %1601 = vst [vmem:[%s2908_s15 + $0x300] sm:$0xff] %v1128_v6 }
 0x254   : > { %1602 = vst [vmem:[%s2908_s15 + $0x308] sm:$0xff] %v1241_v14 }
 0x255   : > { %1628 = vst [vmem:[%s2908_s15 + $0x3d8] sm:$0xff] %v1369_v19 }
 0x256   : > { %1609 = vst [vmem:[%s2908_s15 + $0x340] sm:$0xff] %v1470_v50 }
 0x258   : > { %v1130_v31 = vpop.f32.mrf.mxu2  ;;  %v1243_v43 = vpop.f32.mrf.mxu3 }
 0x259   : > { %v1131_v42 = vadd.f32 %v1130_v31, %v2897_v15  ;;  %v1472_v54 = vpop.f32.mrf.mxu1  ;;  %v1244_v23 = vadd.f32 %v1243_v43, %v2897_v15  ;;  %v1371_v48 = vpop.f32.mrf.mxu0 }
 0x25a   : > { %v1473_v0 = vadd.f32 %v1472_v54, %v2918_v34  ;;  %v1372_v1 = vadd.f32 %v1371_v48, %v2960_v16 }
 0x25b   : > { %1606 = vst [vmem:[%s2908_s15 + $0x328] sm:$0xff] %v1131_v42 }
 0x25c   : > { %1607 = vst [vmem:[%s2908_s15 + $0x330] sm:$0xff] %v1244_v23 }
 0x25d   : > { %1633 = vst [vmem:[%s2908_s15 + $0x400] sm:$0xff] %v1372_v1 }
 0x25e   : > { %1614 = vst [vmem:[%s2908_s15 + $0x368] sm:$0xff] %v1473_v0 }
 0x260   : > { %v1133_v39 = vpop.f32.mrf.mxu2  ;;  %v1246_v53 = vpop.f32.mrf.mxu3 }
 0x261   : > { %v1134_v9 = vadd.f32 %v1133_v39, %v2918_v34  ;;  %v1475_v47 = vpop.f32.mrf.mxu1  ;;  %v1247_v15 = vadd.f32 %v1246_v53, %v2918_v34  ;;  %v1374_v59 = vpop.f32.mrf.mxu0 }
 0x262   : > { %v1476_v52 = vadd.f32 %v1475_v47, %v2937_v63  ;;  %v1375_v18 = vadd.f32 %v1374_v59, %v2978_v36 }
 0x263   : > { %1611 = vst [vmem:[%s2908_s15 + $0x350] sm:$0xff] %v1134_v9 }
 0x264   : > { %1612 = vst [vmem:[%s2908_s15 + $0x358] sm:$0xff] %v1247_v15 }
 0x265   : > { %1638 = vst [vmem:[%s2908_s15 + $0x428] sm:$0xff] %v1375_v18 }
 0x266   : > { %1619 = vst [vmem:[%s2908_s15 + $0x390] sm:$0xff] %v1476_v52 }
 0x268   : > { %v1136_v60 = vpop.f32.mrf.mxu2  ;;  %v1249_v3 = vpop.f32.mrf.mxu3 }
 0x269   : > { %v1137_v2 = vadd.f32 %v1136_v60, %v2937_v63  ;;  %v1478_v5 = vpop.f32.mrf.mxu1  ;;  %v1250_v34 = vadd.f32 %v1249_v3, %v2937_v63  ;;  %v1377_v10 = vpop.f32.mrf.mxu0 }
 0x26a   : > { %v1479_v41 = vadd.f32 %v1478_v5, %v2922_v24  ;;  %v1378_v25 = vadd.f32 %v1377_v10, %v2996_v44 }
 0x26b   : > { %1616 = vst [vmem:[%s2908_s15 + $0x378] sm:$0xff] %v1137_v2 }
 0x26c   : > { %1617 = vst [vmem:[%s2908_s15 + $0x380] sm:$0xff] %v1250_v34 }
 0x26d   : > { %1643 = vst [vmem:[%s2908_s15 + $0x450] sm:$0xff] %v1378_v25 }
 0x26e   : > { %1624 = vst [vmem:[%s2908_s15 + $0x3b8] sm:$0xff] %v1479_v41 }
 0x270   : > { %v1139_v17 = vpop.f32.mrf.mxu2  ;;  %v1252_v12 = vpop.f32.mrf.mxu3 }
 0x271   : > { %v1140_v58 = vadd.f32 %v1139_v17, %v2922_v24  ;;  %v1481_v28 = vpop.f32.mrf.mxu1  ;;  %v1253_v63 = vadd.f32 %v1252_v12, %v2922_v24  ;;  %v1380_v22 = vpop.f32.mrf.mxu0 }
 0x272   : > { %v1482_v33 = vadd.f32 %v1481_v28, %v2942_v49  ;;  %v1381_v21 = vadd.f32 %v1380_v22, %v3014_v51 }
 0x273   : > { %1621 = vst [vmem:[%s2908_s15 + $0x3a0] sm:$0xff] %v1140_v58 }
 0x274   : > { %1622 = vst [vmem:[%s2908_s15 + $0x3a8] sm:$0xff] %v1253_v63 }
 0x275   : > { %1648 = vst [vmem:[%s2908_s15 + $0x478] sm:$0xff] %v1381_v21 }
 0x276   : > { %1629 = vst [vmem:[%s2908_s15 + $0x3e0] sm:$0xff] %v1482_v33 }
 0x278   : > { %v1142_v57 = vpop.f32.mrf.mxu2  ;;  %v1255_v7 = vpop.f32.mrf.mxu3 }
 0x279   : > { %v1143_v40 = vadd.f32 %v1142_v57, %v2942_v49  ;;  %v1484_v13 = vpop.f32.mrf.mxu1  ;;  %v1256_v24 = vadd.f32 %v1255_v7, %v2942_v49  ;;  %v1383_v26 = vpop.f32.mrf.mxu0 }
 0x27a   : > { %v1485_v35 = vadd.f32 %v1484_v13, %v2960_v16  ;;  %v1384_v38 = vadd.f32 %v1383_v26, %v3032_v55 }
 0x27b   : > { %1626 = vst [vmem:[%s2908_s15 + $0x3c8] sm:$0xff] %v1143_v40 }
 0x27c   : > { %1627 = vst [vmem:[%s2908_s15 + $0x3d0] sm:$0xff] %v1256_v24 }
 0x27d   : > { %1653 = vst [vmem:[%s2908_s15 + $0x4a0] sm:$0xff] %v1384_v38 }
 0x27e   : > { %1634 = vst [vmem:[%s2908_s15 + $0x408] sm:$0xff] %v1485_v35 }
 0x280   : > { %v1145_v8 = vpop.f32.mrf.mxu2  ;;  %v1258_v32 = vpop.f32.mrf.mxu3 }
 0x281   : > { %v1146_v20 = vadd.f32 %v1145_v8, %v2960_v16  ;;  %v1487_v29 = vpop.f32.mrf.mxu1  ;;  %v1259_v49 = vadd.f32 %v1258_v32, %v2960_v16  ;;  %v1386_v11 = vpop.f32.mrf.mxu0 }
 0x282   : > { %v1488_v30 = vadd.f32 %v1487_v29, %v2978_v36  ;;  %v1387_v27 = vadd.f32 %v1386_v11, %v3050_v62 }
 0x283   : > { %1631 = vst [vmem:[%s2908_s15 + $0x3f0] sm:$0xff] %v1146_v20 }
 0x284   : > { %1632 = vst [vmem:[%s2908_s15 + $0x3f8] sm:$0xff] %v1259_v49 }
 0x285   : > { %1658 = vst [vmem:[%s2908_s15 + $0x4c8] sm:$0xff] %v1387_v27 }
 0x286   : > { %1639 = vst [vmem:[%s2908_s15 + $0x430] sm:$0xff] %v1488_v30 }
 0x288   : > { %v1148_v61 = vpop.f32.mrf.mxu2  ;;  %v1261_v6 = vpop.f32.mrf.mxu3 }
 0x289   : > { %v1149_v45 = vadd.f32 %v1148_v61, %v2978_v36  ;;  %v1490_v46 = vpop.f32.mrf.mxu1  ;;  %v1262_v16 = vadd.f32 %v1261_v6, %v2978_v36  ;;  %v1389_v37 = vpop.f32.mrf.mxu0 }
 0x28a   : > { %v1491_v14 = vadd.f32 %v1490_v46, %v2996_v44  ;;  %v1390_v4 = vadd.f32 %v1389_v37, %v3068_v56 }
 0x28b   : > { %1636 = vst [vmem:[%s2908_s15 + $0x418] sm:$0xff] %v1149_v45 }
 0x28c   : > { %1637 = vst [vmem:[%s2908_s15 + $0x420] sm:$0xff] %v1262_v16 }
 0x28d   : > { %1663 = vst [vmem:[%s2908_s15 + $0x4f0] sm:$0xff] %v1390_v4 }
 0x28e   : > { %1644 = vst [vmem:[%s2908_s15 + $0x458] sm:$0xff] %v1491_v14 }
 0x290   : > { %v1151_v50 = vpop.f32.mrf.mxu2  ;;  %v1264_v31 = vpop.f32.mrf.mxu3 }
 0x291   : > { %v1152_v19 = vadd.f32 %v1151_v50, %v2996_v44  ;;  %v1493_v42 = vpop.f32.mrf.mxu1  ;;  %v1265_v36 = vadd.f32 %v1264_v31, %v2996_v44 }
 0x292   : > { %v1494_v43 = vadd.f32 %v1493_v42, %v3014_v51 }
 0x293   : > { %1641 = vst [vmem:[%s2908_s15 + $0x440] sm:$0xff] %v1152_v19 }
 0x294   : > { %1642 = vst [vmem:[%s2908_s15 + $0x448] sm:$0xff] %v1265_v36 }
 0x295   : > { %1649 = vst [vmem:[%s2908_s15 + $0x480] sm:$0xff] %v1494_v43 }
 0x298   : > { %v1154_v54 = vpop.f32.mrf.mxu2  ;;  %v1267_v48 = vpop.f32.mrf.mxu3 }
 0x299   : > { %v1155_v23 = vadd.f32 %v1154_v54, %v3014_v51  ;;  %v1496_v0 = vpop.f32.mrf.mxu1  ;;  %v1268_v1 = vadd.f32 %v1267_v48, %v3014_v51 }
 0x29a   : > { %v1497_v39 = vadd.f32 %v1496_v0, %v3032_v55 }
 0x29b   : > { %1646 = vst [vmem:[%s2908_s15 + $0x468] sm:$0xff] %v1155_v23 }
 0x29c   : > { %1647 = vst [vmem:[%s2908_s15 + $0x470] sm:$0xff] %v1268_v1 }
 0x29d   : > { %1654 = vst [vmem:[%s2908_s15 + $0x4a8] sm:$0xff] %v1497_v39 }
 0x2a0   : > { %v1157_v44 = vpop.f32.mrf.mxu2  ;;  %v1270_v53 = vpop.f32.mrf.mxu3 }
 0x2a1   : > { %v1158_v9 = vadd.f32 %v1157_v44, %v3032_v55  ;;  %v1499_v47 = vpop.f32.mrf.mxu1  ;;  %v1271_v15 = vadd.f32 %v1270_v53, %v3032_v55 }
 0x2a2   : > { %v1500_v59 = vadd.f32 %v1499_v47, %v3050_v62 }
 0x2a3   : > { %1651 = vst [vmem:[%s2908_s15 + $0x490] sm:$0xff] %v1158_v9 }
 0x2a4   : > { %1652 = vst [vmem:[%s2908_s15 + $0x498] sm:$0xff] %v1271_v15 }
 0x2a5   : > { %1659 = vst [vmem:[%s2908_s15 + $0x4d0] sm:$0xff] %v1500_v59 }
 0x2a8   : > { %v1160_v51 = vpop.f32.mrf.mxu2  ;;  %v1273_v18 = vpop.f32.mrf.mxu3 }
 0x2a9   : > { %v1161_v52 = vadd.f32 %v1160_v51, %v3050_v62  ;;  %v1502_v60 = vpop.f32.mrf.mxu1  ;;  %v1274_v2 = vadd.f32 %v1273_v18, %v3050_v62 }
 0x2aa   : > { %v1503_v3 = vadd.f32 %v1502_v60, %v3068_v56 }
 0x2ab   : > { %1656 = vst [vmem:[%s2908_s15 + $0x4b8] sm:$0xff] %v1161_v52 }
 0x2ac   : > { %1657 = vst [vmem:[%s2908_s15 + $0x4c0] sm:$0xff] %v1274_v2 }
 0x2ad   : > { %1664 = vst [vmem:[%s2908_s15 + $0x4f8] sm:$0xff] %v1503_v3 }
 0x2b0   : > { %v1163_v55 = vpop.f32.mrf.mxu2  ;;  %v1276_v34 = vpop.f32.mrf.mxu3 }
 0x2b1   : > { %v1164_v5 = vadd.f32 %v1163_v55, %v3068_v56  ;;  %v1277_v62 = vadd.f32 %v1276_v34, %v3068_v56 }
 0x2b3   : > { %1661 = vst [vmem:[%s2908_s15 + $0x4e0] sm:$0xff] %v1164_v5 }
 0x2b4   : > { %1662 = vst [vmem:[%s2908_s15 + $0x4e8] sm:$0xff] %v1277_v62 }
 0x2b5   : > { %2121 = shalt.err (!%p2118_p8)
}
 0x2b6   : > { %s2171_s25 = smov 640   ;;  %s2172_s17 = smov 1280  }
 0x2b7   : > { %s2173_s16 = smov 40  }
 0x2b8   : > { %1963 = dma.vmem_to_hbm [thread:$0]  (%p2256_p11), %s1679_s22, 20480, %s1681_s7, %s1666_s29, %s2171_s25, %s2172_s17, %s2173_s16  }
 0x2b9 PF: > { %s1695_s13 = sand.u32 1, %s2152_s18   ;;  %p3495_p9 = scmp.ge.s32.totalorder %s2164_s21, 2 }
 0x2ba   : > { %s1696_s15 = scalar_lea.sflag [#allocation4], %s1695_s13 }
 0x2bb   : > { %p1974_p10 = pnand %p3495_p9, %p2260_p12 }
 0x2bd   : > { %p1975_p1 = pneg %p1974_p10 }
 0x2bf   : > { %2147 = dma.done.wait (%p1975_p1), %s1696_s15, 20480  }
 0x2c0   : > { %2149 = vsyncadd (%p1975_p1), %s1696_s15, 4294946816  ;;  %s3496_s23 = sld [smem:[#allocation11_spill]]  ;;  %p19_p2 = scmp.ge.s32.totalorder %s2229_s24, 4  }
 0x2c1   : > { %s3497_s18 = smov %s2156_s19  ;;  %s3498_s19 = smov %s2160_s20 }
 0x2c2   : > { %s3500_s21 = smov %s2229_s24  ;;  %21 = sbr.rel (!%p19_p2) target bundleno = 8 (0x8), region = 89 }
 0x2c6   : > { %s3499_s20 = smov %s3496_s23 }
 0x2c7   :  { %1702 = vsyncpa [#allocation3], 1 }
 0x2c8   :  { %1704 = vsyncpa [#allocation3 + $0x1], 1 }
 0x2c9   :  { %1705 = vsyncpa [#allocation6], 1 }
 0x2ca   :  { %1706 = vsyncpa [#allocation4], 1 }
 0x2cb   :  { %1708 = vsyncpa [#allocation4 + $0x1], 1 }

</bundles_post_ra>
